<compile_context>
chip_gen: v7x
topology: tpu7x:2x2x1
jax: 0.10.0
libtpu: 0.0.40
codegen_flags: <defaults>
</compile_context>

<pallas_src>
import functools

import jax
import jax.numpy as jnp
from jax.experimental import pallas as pl
from jax.experimental.pallas import tpu as pltpu

# Logical channel sizes (from the module) and their TPU-friendly padded sizes.
C_IN, C0, C1, C2 = 2, 29, 80, 3
C0_PAD, C1_PAD, C2_PAD = 32, 88, 8      # h0 "ones" row at index C0, h1n at index C1


def _fused_kernel(x_ref, p_ref, w1_ref, w2_ref, o_ref, *, m_real: int, eps: float):
    mp = x_ref.shape[1]                       # padded spatial size (multiple of 128)

    x = x_ref[...]                            # (C_IN, MP) f32, channel-major
    p = p_ref[...]                            # (C1_PAD, 8) f32 per-channel slab

    w0a = p[:C0_PAD, 0:1]                     # conv0 weight, input channel 0
    w0b = p[:C0_PAD, 1:2]                     # conv0 weight, input channel 1
    b0 = p[:C0_PAD, 2:3]                      # conv0 bias (row C0 == 1 -> ones row)
    gamma = p[:, 3:4]                         # BN weight (rows >= C1 are 0)
    beta = p[:, 4:5]                          # BN bias   (row C1 == 1 -> ones row)

    # Lane mask over the real spatial columns; padded columns of h0 are zeroed so
    # h1's padded columns are exactly zero and the BN sums need no extra masking.
    lane = jax.lax.broadcasted_iota(jnp.int32, (1, mp), 1)
    mask = (lane < m_real).astype(jnp.float32)                      # (1, MP)

    # conv0 (1x1, K=2) on the VPU: two broadcast FMAs + ReLU0, masked.
    # Row C0 (w=0, b=1) becomes the "ones" row that carries conv1's bias.
    h0 = jnp.maximum(w0a * x[0:1, :] + w0b * x[1:2, :] + b0, 0.0) * mask  # (32, MP)

    # conv1 + bias (augmented GEMM) on the MXU, bf16 operands, f32 accumulation.
    h1 = jnp.dot(w1_ref[...], h0.astype(jnp.bfloat16),
                 preferred_element_type=jnp.float32)                # (88, MP) f32

    # BatchNorm2d (training mode, biased variance): one-pass statistics over the
    # real lanes (padded lanes of h1 are exactly zero), folded into a per-channel
    # scale/shift so normalization + ReLU1 is a single FMA + max per element.
    inv_m = 1.0 / float(m_real)
    s1 = jnp.sum(h1, axis=1, keepdims=True)                         # (88, 1)
    s2 = jnp.sum(h1 * h1, axis=1, keepdims=True)                    # (88, 1)
    mean = s1 * inv_m
    var = jnp.maximum(s2 * inv_m - mean * mean, 0.0)                # guard cancellation
    scale = gamma * jax.lax.rsqrt(var + eps)
    shift = beta - mean * scale
    h1n = jnp.maximum(h1 * scale + shift, 0.0)                      # BN + ReLU1
    # Row C1 of h1 is all-zero with gamma=0 / beta=1 -> h1n row C1 == 1 (the
    # "ones" row that carries conv2's bias through the MXU).

    # conv2 + bias (augmented GEMM) on the MXU + ReLU2.
    h2 = jnp.dot(w2_ref[...], h1n.astype(jnp.bfloat16),
                 preferred_element_type=jnp.float32)                # (8, MP)
    o_ref[...] = jnp.maximum(h2, 0.0)


def init_params(key):
    """Parameters in natural (PyTorch-like) shapes."""
    ks = jax.random.split(key, 6)

    def conv_init(kw, kb, cin, cout):
        bound = 1.0 / (float(cin) ** 0.5)
        w = jax.random.uniform(kw, (cout, cin), jnp.float32, -bound, bound)
        b = jax.random.uniform(kb, (cout,), jnp.float32, -bound, bound)
        return w, b

    w0, b0 = conv_init(ks[0], ks[1], C_IN, C0)
    w1, b1 = conv_init(ks[2], ks[3], C0, C1)
    w2, b2 = conv_init(ks[4], ks[5], C1, C2)
    gamma = jnp.ones((C1,), jnp.float32)      # BatchNorm2d default affine weight
    beta = jnp.zeros((C1,), jnp.float32)      # BatchNorm2d default affine bias
    return (w0, b0, w1, b1, gamma, beta, w2, b2)


def pack_params(params):
    """Pack the 9 small tensors into 3 contiguous buffers (done once at init)."""
    w0, b0, w1, b1, gamma, beta, w2, b2 = params

    # f32 per-channel slab: columns = [w0[:,0], w0[:,1], b0, gamma, beta, 0, 0, 0]
    p = jnp.zeros((C1_PAD, 8), jnp.float32)
    p = p.at[:C0, 0].set(w0[:, 0])
    p = p.at[:C0, 1].set(w0[:, 1])
    p = p.at[:C0, 2].set(b0)
    p = p.at[C0, 2].set(1.0)          # h0 "ones" row bias  -> folds conv1 bias
    p = p.at[:C1, 3].set(gamma)       # gamma rows >= C1 stay 0 (scale 0 on pad rows)
    p = p.at[:C1, 4].set(beta)
    p = p.at[C1, 4].set(1.0)          # h1n "ones" row beta -> folds conv2 bias

    # conv1 augmented weight (bf16): [w1 | b1 | 0], contraction dim = C0_PAD.
    w1a = jnp.zeros((C1_PAD, C0_PAD), jnp.float32)
    w1a = w1a.at[:C1, :C0].set(w1)
    w1a = w1a.at[:C1, C0].set(b1)

    # conv2 augmented weight (bf16): [w2 | b2 | 0], contraction dim = C1_PAD.
    w2a = jnp.zeros((C2_PAD, C1_PAD), jnp.float32)
    w2a = w2a.at[:C2, :C1].set(w2)
    w2a = w2a.at[:C2, C1].set(b2)

    return p, w1a.astype(jnp.bfloat16), w2a.astype(jnp.bfloat16)


def model_forward(x_nchw, packed):
    p_f32, w1a_bf16, w2a_bf16 = packed
    N, C, H, W = x_nchw.shape
    assert N == 1 and C == C_IN, "kernel assumes N=1, Cin=2 (as in the module)"
    M = N * H * W
    MP = ((M + 127) // 128) * 128

    # NCHW with N=1 is already channel-major -> free reshape; zero-pad lanes.
    x2d = x_nchw.reshape(C, M).astype(jnp.float32)
    x2d = jnp.pad(x2d, ((0, 0), (0, MP - M)))

    kernel = functools.partial(_fused_kernel, m_real=M, eps=1e-5)

    def full(shape):
        return pl.BlockSpec(shape, lambda *_: (0,) * len(shape))

    flops = 2 * M * (C_IN * C0 + C0 * C1 + C1 * C2)
    bytes_accessed = (4 * x2d.size + 4 * p_f32.size + 2 * w1a_bf16.size
                      + 2 * w2a_bf16.size + 4 * C2_PAD * MP)

    out = pl.pallas_call(
        kernel,
        out_shape=jax.ShapeDtypeStruct((C2_PAD, MP), jnp.float32),
        grid=(1,),
        in_specs=[
            full(x2d.shape),
            full(p_f32.shape),
            full(w1a_bf16.shape),
            full(w2a_bf16.shape),
        ],
        out_specs=full((C2_PAD, MP)),
        compiler_params=pltpu.CompilerParams(
            dimension_semantics=("arbitrary",)),
        cost_estimate=pl.CostEstimate(
            flops=int(flops),
            transcendentals=int(C1_PAD),          # rsqrt per BN channel
            bytes_accessed=int(bytes_accessed)),
    )(x2d, p_f32, w1a_bf16, w2a_bf16)

    # Slice the real channels/lanes back out; with N=1 the reshape is free.
    return out[:C2, :M].reshape(N, C2, H, W)


def reference_forward(x_nchw, params):
    """Pure-JAX f32 reference (two-pass variance) for the correctness check."""
    w0, b0, w1, b1, gamma, beta, w2, b2 = params
    N, C, H, W = x_nchw.shape
    M = N * H * W
    x = x_nchw.reshape(C, M).astype(jnp.float32)
    h0 = jnp.maximum(w0 @ x + b0[:, None], 0.0)
    h1 = w1 @ h0 + b1[:, None]
    mean = jnp.mean(h1, axis=1, keepdims=True)
    var = jnp.mean((h1 - mean) ** 2, axis=1, keepdims=True)
    h1n = jnp.maximum((h1 - mean) * jax.lax.rsqrt(var + 1e-5) * gamma[:, None]
                      + beta[:, None], 0.0)
    h2 = jnp.maximum(w2 @ h1n + b2[:, None], 0.0)
    return h2.reshape(N, C2, H, W)


if __name__ == "__main__":
    key = jax.random.PRNGKey(0)
    k_x, k_p = jax.random.split(key)
    x6 = jax.random.normal(k_x, (1, 2, 51, 17), jnp.float32)   # NCHW, as in module
    params = init_params(k_p)
    packed = pack_params(params)

    y = jax.block_until_ready(model_forward(x6, packed))
    assert y.shape == (1, 3, 51, 17), y.shape

    y_ref = reference_forward(x6, params)
    err = float(jnp.max(jnp.abs(y - y_ref)))
    assert jnp.allclose(y, y_ref, rtol=5e-2, atol=5e-2), f"max abs err = {err}"

    print("KERNEL_OK")
</pallas_src>

<mosaic_0001>
module attributes {stable_mosaic.version = 11 : i64} {
  func.func @_fused_kernel(%arg0: i32, %arg1: memref<2x896xf32, #tpu.memory_space<vmem>>, %arg2: memref<88x8xf32, #tpu.memory_space<vmem>>, %arg3: memref<88x32xbf16, #tpu.memory_space<vmem>>, %arg4: memref<8x88xbf16, #tpu.memory_space<vmem>>, %arg5: memref<8x896xf32, #tpu.memory_space<vmem>>) attributes {dimension_semantics = [#tpu.dimension_semantics<arbitrary>], iteration_bounds = array<i64: 1>, scalar_prefetch = 0 : i64, scratch_operands = 0 : i64, tpu.core_type = #tpu.core_type<tc>, window_params = [{pipeline_mode = #tpu.pipeline_mode<synchronous>, transform_indices = @transform_0, window_bounds = array<i64: 2, 896>}, {pipeline_mode = #tpu.pipeline_mode<synchronous>, transform_indices = @transform_1, window_bounds = array<i64: 88, 8>}, {pipeline_mode = #tpu.pipeline_mode<synchronous>, transform_indices = @transform_2, window_bounds = array<i64: 88, 32>}, {pipeline_mode = #tpu.pipeline_mode<synchronous>, transform_indices = @transform_3, window_bounds = array<i64: 8, 88>}, {pipeline_mode = #tpu.pipeline_mode<synchronous>, transform_indices = @transform_4, window_bounds = array<i64: 8, 896>}]} {
    %c0 = arith.constant 0 : index
    %c0_0 = arith.constant 0 : index
    %0 = vector.load %arg1[%c0, %c0_0] : memref<2x896xf32, #tpu.memory_space<vmem>>, vector<2x896xf32>
    %c0_1 = arith.constant 0 : index
    %c0_2 = arith.constant 0 : index
    %1 = vector.load %arg2[%c0_1, %c0_2] : memref<88x8xf32, #tpu.memory_space<vmem>>, vector<88x8xf32>
    %2 = vector.extract_strided_slice %1 {offsets = [0, 0], sizes = [32, 1], strides = [1, 1]} : vector<88x8xf32> to vector<32x1xf32>
    %3 = vector.extract_strided_slice %1 {offsets = [0, 1], sizes = [32, 1], strides = [1, 1]} : vector<88x8xf32> to vector<32x1xf32>
    %4 = vector.extract_strided_slice %1 {offsets = [0, 2], sizes = [32, 1], strides = [1, 1]} : vector<88x8xf32> to vector<32x1xf32>
    %5 = vector.extract_strided_slice %1 {offsets = [0, 3], sizes = [88, 1], strides = [1, 1]} : vector<88x8xf32> to vector<88x1xf32>
    %6 = vector.extract_strided_slice %1 {offsets = [0, 4], sizes = [88, 1], strides = [1, 1]} : vector<88x8xf32> to vector<88x1xf32>
    %7 = tpu.iota {dimensions = array<i32: 1>} : vector<1x896xi32>
    %c867_i32 = arith.constant 867 : i32
    %8 = vector.broadcast %c867_i32 : i32 to vector<1x896xi32>
    %9 = arith.cmpi slt, %7, %8 : vector<1x896xi32>
    %10 = arith.extui %9 : vector<1x896xi1> to vector<1x896xi32>
    %11 = arith.sitofp %10 : vector<1x896xi32> to vector<1x896xf32>
    %12 = vector.extract_strided_slice %0 {offsets = [0, 0], sizes = [1, 896], strides = [1, 1]} : vector<2x896xf32> to vector<1x896xf32>
    %13 = vector.broadcast %2 : vector<32x1xf32> to vector<32x896xf32>
    %14 = vector.broadcast %12 : vector<1x896xf32> to vector<32x896xf32>
    %15 = arith.mulf %13, %14 : vector<32x896xf32>
    %16 = vector.extract_strided_slice %0 {offsets = [1, 0], sizes = [1, 896], strides = [1, 1]} : vector<2x896xf32> to vector<1x896xf32>
    %17 = vector.broadcast %3 : vector<32x1xf32> to vector<32x896xf32>
    %18 = vector.broadcast %16 : vector<1x896xf32> to vector<32x896xf32>
    %19 = arith.mulf %17, %18 : vector<32x896xf32>
    %20 = arith.addf %15, %19 : vector<32x896xf32>
    %21 = vector.broadcast %4 : vector<32x1xf32> to vector<32x896xf32>
    %22 = arith.addf %20, %21 : vector<32x896xf32>
    %cst = arith.constant 0.000000e+00 : f32
    %23 = vector.broadcast %cst : f32 to vector<32x896xf32>
    %24 = arith.maximumf %22, %23 : vector<32x896xf32>
    %25 = vector.broadcast %11 : vector<1x896xf32> to vector<32x896xf32>
    %26 = arith.mulf %24, %25 : vector<32x896xf32>
    %c0_3 = arith.constant 0 : index
    %c0_4 = arith.constant 0 : index
    %27 = vector.load %arg3[%c0_3, %c0_4] : memref<88x32xbf16, #tpu.memory_space<vmem>>, vector<88x32xbf16>
    %28 = arith.truncf %26 : vector<32x896xf32> to vector<32x896xbf16>
    %cst_5 = arith.constant dense<0.000000e+00> : vector<88x896xf32>
    %29 = tpu.matmul %27, %28, %cst_5 {dimension_numbers = #tpu.dot_dimension_numbers<[1], [0], [0], [1], [0, 0, 1, 1], [], []>} : vector<88x32xbf16>, vector<32x896xbf16>, vector<88x896xf32> -> vector<88x896xf32>
    %cst_6 = arith.constant dense<0.000000e+00> : vector<88xf32>
    %30 = vector.multi_reduction <add>, %29, %cst_6 [1] : vector<88x896xf32> to vector<88xf32>
    %31 = vector.shape_cast %30 : vector<88xf32> to vector<88x1xf32>
    %32 = arith.mulf %29, %29 : vector<88x896xf32>
    %cst_7 = arith.constant dense<0.000000e+00> : vector<88xf32>
    %33 = vector.multi_reduction <add>, %32, %cst_7 [1] : vector<88x896xf32> to vector<88xf32>
    %34 = vector.shape_cast %33 : vector<88xf32> to vector<88x1xf32>
    %cst_8 = arith.constant 0.0011534025 : f32
    %35 = vector.broadcast %cst_8 : f32 to vector<88x1xf32>
    %36 = arith.mulf %31, %35 : vector<88x1xf32>
    %cst_9 = arith.constant 0.0011534025 : f32
    %37 = vector.broadcast %cst_9 : f32 to vector<88x1xf32>
    %38 = arith.mulf %34, %37 : vector<88x1xf32>
    %39 = arith.mulf %36, %36 : vector<88x1xf32>
    %40 = arith.subf %38, %39 : vector<88x1xf32>
    %cst_10 = arith.constant 0.000000e+00 : f32
    %41 = vector.broadcast %cst_10 : f32 to vector<88x1xf32>
    %42 = arith.maximumf %40, %41 : vector<88x1xf32>
    %cst_11 = arith.constant 9.99999974E-6 : f32
    %43 = vector.broadcast %cst_11 : f32 to vector<88x1xf32>
    %44 = arith.addf %42, %43 : vector<88x1xf32>
    %45 = math.rsqrt %44 : vector<88x1xf32>
    %46 = arith.mulf %5, %45 : vector<88x1xf32>
    %47 = arith.mulf %36, %46 : vector<88x1xf32>
    %48 = arith.subf %6, %47 : vector<88x1xf32>
    %49 = vector.broadcast %46 : vector<88x1xf32> to vector<88x896xf32>
    %50 = arith.mulf %29, %49 : vector<88x896xf32>
    %51 = vector.broadcast %48 : vector<88x1xf32> to vector<88x896xf32>
    %52 = arith.addf %50, %51 : vector<88x896xf32>
    %cst_12 = arith.constant 0.000000e+00 : f32
    %53 = vector.broadcast %cst_12 : f32 to vector<88x896xf32>
    %54 = arith.maximumf %52, %53 : vector<88x896xf32>
    %c0_13 = arith.constant 0 : index
    %c0_14 = arith.constant 0 : index
    %55 = vector.load %arg4[%c0_13, %c0_14] : memref<8x88xbf16, #tpu.memory_space<vmem>>, vector<8x88xbf16>
    %56 = arith.truncf %54 : vector<88x896xf32> to vector<88x896xbf16>
    %cst_15 = arith.constant dense<0.000000e+00> : vector<8x896xf32>
    %57 = tpu.matmul %55, %56, %cst_15 {dimension_numbers = #tpu.dot_dimension_numbers<[1], [0], [0], [1], [0, 0, 1, 1], [], []>} : vector<8x88xbf16>, vector<88x896xbf16>, vector<8x896xf32> -> vector<8x896xf32>
    %cst_16 = arith.constant 0.000000e+00 : f32
    %58 = vector.broadcast %cst_16 : f32 to vector<8x896xf32>
    %59 = arith.maximumf %57, %58 : vector<8x896xf32>
    %c0_17 = arith.constant 0 : index
    %c0_18 = arith.constant 0 : index
    %60 = vector.load %arg5[%c0_17, %c0_18] : memref<8x896xf32, #tpu.memory_space<vmem>>, vector<8x896xf32>
    tpu.vector_store %arg5[%c0_17, %c0_18], %59 {strides = array<i32>} : memref<8x896xf32, #tpu.memory_space<vmem>>, vector<8x896xf32>,
    return
  }
  func.func @transform_0(%arg0: i32) -> (i32, i32) {
    %c0_i32 = arith.constant 0 : i32
    %c0_i32_0 = arith.constant 0 : i32
    %c0_i32_1 = arith.constant 0 : i32
    return %c0_i32, %c0_i32_0 : i32, i32
  }
  func.func @transform_1(%arg0: i32) -> (i32, i32) {
    %c0_i32 = arith.constant 0 : i32
    %c0_i32_0 = arith.constant 0 : i32
    %c0_i32_1 = arith.constant 0 : i32
    return %c0_i32, %c0_i32_0 : i32, i32
  }
  func.func @transform_2(%arg0: i32) -> (i32, i32) {
    %c0_i32 = arith.constant 0 : i32
    %c0_i32_0 = arith.constant 0 : i32
    %c0_i32_1 = arith.constant 0 : i32
    return %c0_i32, %c0_i32_0 : i32, i32
  }
  func.func @transform_3(%arg0: i32) -> (i32, i32) {
    %c0_i32 = arith.constant 0 : i32
    %c0_i32_0 = arith.constant 0 : i32
    %c0_i32_1 = arith.constant 0 : i32
    return %c0_i32, %c0_i32_0 : i32, i32
  }
  func.func @transform_4(%arg0: i32) -> (i32, i32) {
    %c0_i32 = arith.constant 0 : i32
    %c0_i32_0 = arith.constant 0 : i32
    %c0_i32_1 = arith.constant 0 : i32
    return %c0_i32, %c0_i32_0 : i32, i32
  }
}

</mosaic_0001>

<bundles_post_ra>
// kernel: tpu_custom_call.1
= control target key start
LH: loop header
LB: loop body
LE: loop exit
PB: predicated region body
PF: predicated region fallthrough
CT: control target
= control target key end

     0   :  { %v2011_v1 = vmov 1   ;;  %v3377_v2 = vmov 0   ;;  %s3372_s0 = inlined_call_operand.vmem [shape: f32[2,896], index: 0, kind: input, shape index: {}]   ;;  %s3373_s1 = inlined_call_operand.vmem [shape: f32[88,8], index: 1, kind: input, shape index: {}]   ;;  %s3374_s2 = inlined_call_operand.vmem [shape: bf16[88,32], index: 2, kind: input, shape index: {}]   ;;  %s3375_s3 = inlined_call_operand.vmem [shape: bf16[8,88], index: 3, kind: input, shape index: {}]   ;;  %s3376_s4 = inlined_call_operand.hbm [shape: f32[8,896], index: 4, kind: output, shape index: {}]  }
   0x1   :  { %v21_v0 = vld [vmem:[%s3373_s1] sm:$0xff]  ;;  %1941 = vset.pattern.permute.xlu1 %v2011_v1  ;;  %1940 = vset.pattern.permute.xlu0 %v3377_v2  ;;  %v22_v3 = vld [vmem:[%s3373_s1 + $0x8] sm:$0xff]  ;;  %v23_v4 = vld [vmem:[%s3373_s1 + $0x10] sm:$0xff] }
   0x2   :  { %175 = vperm.xlu1 %1941, %v21_v0   ;;  %63 = vperm.xlu0 %1940, %v21_v0  }
   0x3   :  { %513 = vmatprep.mubr.bf16.mxu0 %v3377_v2  ;;  %563 = vmatprep.mubr.bf16.mxu1 %v3377_v2 }
   0x6   :  { %179 = vperm.xlu1 %1941, %v22_v3   ;;  %68 = vperm.xlu0 %1940, %v22_v3  }
   0x7   :  { %9 = vsyncpa [#allocation3], 0  ;;  %v24_v5 = vld [vmem:[%s3373_s1 + $0x18] sm:$0xff]  ;;  %v2013_v6 = vmov 2   ;;  %v32_v7 = vlaneseq  ;;  %v19_v13 = vld [vmem:[%s3372_s0] sm:$0xff]  ;;  %vm462_vm1 = vcmask 261120  }
   0x8   :  { %v20_v16 = vld [vmem:[%s3372_s0 + $0x8] sm:$0x3f]  ;;  %s2016_s15 = smov 1   ;;  %vm1629_vm2 = vcmask 1043456   ;;  %vm1625_vm3 = vcmask 719872   ;;  %vm2018_vm4 = vmmov 0  }
   0x9   :  { %v84_v8 = vshrl.u32 %v32_v7, 7  ;;  %v33_v31 = vand.u32 127, %v32_v7 }
   0xa   :  { %1942 = vset.pattern.permute.xlu1 %v3377_v2  ;;  %73 = vperm.xlu0 %1940, %v23_v4  }
   0xb   :  { %78 = vperm.xlu1 %1942, %v24_v5   ;;  %v85_v9 = vsub.s32 0, %v84_v8  ;;  %v89_v10 = vsub.s32 2, %v84_v8  ;;  %v192_v11 = vsub.s32 1, %v84_v8  ;;  %v196_v12 = vsub.s32 3, %v84_v8 }
   0xc   :  { %v97_v14 = vsub.s32 6, %v84_v8  ;;  %v204_v15 = vsub.s32 7, %v84_v8  ;;  %v93_v17 = vsub.s32 4, %v84_v8  ;;  %v200_v18 = vsub.s32 5, %v84_v8 }
   0xd   :  { %v90_v19 = vrot.slane %v19_v13, %v89_v10  ;;  %v197_v20 = vrot.slane %v19_v13, %v196_v12  ;;  %v86_v21 = vrot.slane %v19_v13, %v85_v9  ;;  %v193_v22 = vrot.slane %v19_v13, %v192_v11 }
   0xe   :  { %1943 = vset.pattern.permute.xlu0 %v2011_v1  ;;  %v98_v23 = vrot.slane %v19_v13, %v97_v14  ;;  %v205_v24 = vrot.slane %v19_v13, %v204_v15  ;;  %v106_v25 = vrot.slane %v20_v16, %v89_v10  ;;  %v213_v26 = vrot.slane %v20_v16, %v196_v12 }
   0xf   :  { %1944 = vset.pattern.permute.xlu1 %v2011_v1  ;;  %183 = vperm.xlu0 %1943, %v23_v4   ;;  %v94_v27 = vrot.slane %v19_v13, %v93_v17  ;;  %v201_v28 = vrot.slane %v19_v13, %v200_v18  ;;  %v102_v29 = vrot.slane %v20_v16, %v85_v9  ;;  %v2083_v48 = vadd.s32 768, %v33_v31 }
  0x10   :  { %187 = vperm.xlu1 %1944, %v24_v5   ;;  %v209_v30 = vrot.slane %v20_v16, %v192_v11  ;;  %v110_v32 = vrot.slane %v20_v16, %v93_v17  ;;  %v217_v33 = vrot.slane %v20_v16, %v200_v18  ;;  %v125_v34 = vrot.slane %v90_v19, %v85_v9 }
  0x11   :  { %v2067_v35 = vrot.slane %v197_v20, %v192_v11  ;;  %v121_v36 = vrot.slane %v86_v21, %v85_v9  ;;  %v2069_v37 = vrot.slane %v193_v22, %v192_v11  ;;  %v133_v40 = vrot.slane %v98_v23, %v85_v9 }
  0x12   :  { %v2075_v41 = vrot.slane %v205_v24, %v192_v11  ;;  %v141_v42 = vrot.slane %v106_v25, %v85_v9  ;;  %v2077_v43 = vrot.slane %v213_v26, %v192_v11  ;;  %v129_v44 = vrot.slane %v94_v27, %v85_v9 }
  0x13   :  { %1946 = vset.pattern.permute.xlu0 %v2013_v6  ;;  %v2079_v45 = vrot.slane %v201_v28, %v192_v11  ;;  %v137_v46 = vrot.slane %v102_v29, %v85_v9  ;;  %v2081_v47 = vrot.slane %v209_v30, %v192_v11  ;;  %v2085_v49 = vrot.slane %v110_v32, %v85_v9 }
  0x14   :  { %1945 = vset.pattern.permute.xlu1 %v2013_v6  ;;  %314 = vperm.xlu0 %1946, %v22_v3   ;;  %v2087_v50 = vrot.slane %v217_v33, %v192_v11  ;;  %vm46_vm0 = vcmp.lt.s32.totalorder %v2083_v48, 867 }
  0x15   :  { %310 = vperm.xlu1 %1945, %v21_v0  }
  0x19   :  { %318 = vperm.xlu1 %1945, %v23_v4  }
  0x1d   :  { %322 = vperm.xlu1 %1945, %v24_v5  }
  0x81   :  { %v2071_v38 = vpop.permute.xlu1 %175  ;;  %v2073_v39 = vpop.permute.xlu0 %63 }
  0x82   :  { %v147_v51 = vmul.f32 %v125_v34, %v2073_v39  ;;  %v254_v52 = vmul.f32 %v2067_v35, %v2071_v38  ;;  %v146_v53 = vmul.f32 %v121_v36, %v2073_v39  ;;  %v253_v54 = vmul.f32 %v2069_v37, %v2071_v38 }
  0x83   :  { %v149_v57 = vmul.f32 %v133_v40, %v2073_v39  ;;  %v256_v58 = vmul.f32 %v2075_v41, %v2071_v38  ;;  %v151_v59 = vmul.f32 %v141_v42, %v2073_v39  ;;  %v258_v60 = vmul.f32 %v2077_v43, %v2071_v38 }
  0x84   :  { %v148_v6 = vmul.f32 %v129_v44, %v2073_v39  ;;  %v255_v8 = vmul.f32 %v2079_v45, %v2071_v38  ;;  %v282_v11 = vadd.f32 %v254_v52, %v147_v51  ;;  %v281_v12 = vadd.f32 %v253_v54, %v146_v53 }
  0x85   :  { %v180_v55 = vpop.permute.xlu1 %179  ;;  %v69_v56 = vpop.permute.xlu0 %68  ;;  %v150_v13 = vmul.f32 %v137_v46, %v2073_v39  ;;  %v257_v14 = vmul.f32 %v2081_v47, %v2071_v38  ;;  %v284_v16 = vadd.f32 %v256_v58, %v149_v57  ;;  %v286_v17 = vadd.f32 %v258_v60, %v151_v59 }
  0x86   :  { %v154_v61 = vmul.f32 %v125_v34, %v69_v56  ;;  %v261_v62 = vmul.f32 %v2067_v35, %v180_v55  ;;  %v153_v63 = vmul.f32 %v121_v36, %v69_v56  ;;  %v260_v0 = vmul.f32 %v2069_v37, %v180_v55 }
  0x87   :  { %v156_v1 = vmul.f32 %v133_v40, %v69_v56  ;;  %v263_v3 = vmul.f32 %v2075_v41, %v180_v55  ;;  %v158_v4 = vmul.f32 %v141_v42, %v69_v56  ;;  %v265_v5 = vmul.f32 %v2077_v43, %v180_v55 }
  0x88   :  { %v155_v7 = vmul.f32 %v129_v44, %v69_v56  ;;  %v262_v9 = vmul.f32 %v2079_v45, %v180_v55  ;;  %v157_v18 = vmul.f32 %v137_v46, %v69_v56  ;;  %v264_v19 = vmul.f32 %v2081_v47, %v180_v55 }
  0x89   :  { %v2109_v10 = vpop.permute.xlu0 %73  ;;  %v289_v20 = vadd.f32 %v261_v62, %v154_v61  ;;  %v288_v21 = vadd.f32 %v260_v0, %v153_v63  ;;  %v291_v22 = vadd.f32 %v263_v3, %v156_v1  ;;  %v293_v23 = vadd.f32 %v265_v5, %v158_v4 }
  0x8a   :  { %v2114_v15 = vpop.permute.xlu1 %78  ;;  %v161_v24 = vmul.f32 %v125_v34, %v2109_v10  ;;  %v160_v25 = vmul.f32 %v121_v36, %v2109_v10  ;;  %v283_v26 = vadd.f32 %v255_v8, %v148_v6  ;;  %v290_v27 = vadd.f32 %v262_v9, %v155_v7 }
  0x8b   :  { %v168_v28 = vmul.f32 %v125_v34, %v2114_v15  ;;  %v167_v29 = vmul.f32 %v121_v36, %v2114_v15  ;;  %v285_v30 = vadd.f32 %v257_v14, %v150_v13  ;;  %v163_v31 = vmul.f32 %v133_v40, %v2109_v10 }
  0x8c   :  { %v292_v33 = vadd.f32 %v264_v19, %v157_v18  ;;  %v170_v51 = vmul.f32 %v133_v40, %v2114_v15  ;;  %v165_v52 = vmul.f32 %v141_v42, %v2109_v10  ;;  %v172_v53 = vmul.f32 %v141_v42, %v2114_v15 }
  0x8d   :  { %v2138_v40 = vmul.f32 %v129_v44, %v2109_v10  ;;  %v2141_v59 = vmul.f32 %v129_v44, %v2114_v15  ;;  %v2144_v42 = vmul.f32 %v137_v46, %v2109_v10  ;;  %v2147_v60 = vmul.f32 %v137_v46, %v2114_v15 }
  0x8e   :  { %v2122_v32 = vpop.permute.xlu0 %183  ;;  %v2152_v61 = vmul.f32 %v2085_v49, %v2073_v39  ;;  %v2155_v62 = vmul.f32 %v2085_v49, %v69_v56  ;;  %v2159_v63 = vmul.f32 %v2087_v50, %v2071_v38  ;;  %v2162_v44 = vmul.f32 %v2087_v50, %v180_v55 }
  0x8f   :  { %v2127_v54 = vpop.permute.xlu1 %187  ;;  %v268_v57 = vmul.f32 %v2067_v35, %v2122_v32  ;;  %v267_v34 = vmul.f32 %v2069_v37, %v2122_v32  ;;  %v270_v36 = vmul.f32 %v2075_v41, %v2122_v32  ;;  %v272_v58 = vmul.f32 %v2077_v43, %v2122_v32 }
  0x90   :  { %v275_v46 = vmul.f32 %v2067_v35, %v2127_v54  ;;  %v274_v0 = vmul.f32 %v2069_v37, %v2127_v54  ;;  %v277_v39 = vmul.f32 %v2075_v41, %v2127_v54  ;;  %v279_v56 = vmul.f32 %v2077_v43, %v2127_v54 }
  0x91   :  { %v296_v3 = vadd.f32 %v268_v57, %v161_v24  ;;  %v295_v38 = vadd.f32 %v267_v34, %v160_v25  ;;  %v298_v4 = vadd.f32 %v270_v36, %v163_v31  ;;  %v300_v5 = vadd.f32 %v272_v58, %v165_v52 }
  0x92   :  { %v303_v18 = vadd.f32 %v275_v46, %v168_v28  ;;  %v302_v19 = vadd.f32 %v274_v0, %v167_v29  ;;  %v269_v36 = vmul.f32 %v2079_v45, %v2122_v32  ;;  %v3378_v58 = vmov 0.0  }
  0x93   :  { %v2172_v1 = vpop.permute.xlu0 %314  ;;  %v2201_v46 = vsel %vm46_vm0, 1.0, %v3378_v58 }
  0x94   :  { %v2174_v55 = vpop.permute.xlu1 %310  ;;  %v333_v6 = vadd.f32 %v2172_v1, %v289_v20  ;;  %v332_v35 = vadd.f32 %v2172_v1, %v288_v21  ;;  %v335_v37 = vadd.f32 %v2172_v1, %v291_v22  ;;  %v337_v7 = vadd.f32 %v2172_v1, %v293_v23 }
  0x95   :  { %v326_v41 = vadd.f32 %v2174_v55, %v282_v11  ;;  %v325_v43 = vadd.f32 %v2174_v55, %v281_v12  ;;  %v328_v8 = vadd.f32 %v2174_v55, %v284_v16  ;;  %v330_v9 = vadd.f32 %v2174_v55, %v286_v17 }
  0x96   :  { %v361_v13 = vmax.f32 %v333_v6, 0.0  ;;  %v360_v14 = vmax.f32 %v332_v35, 0.0  ;;  %v363_v25 = vmax.f32 %v335_v37, 0.0  ;;  %v305_v21 = vadd.f32 %v277_v39, %v170_v51 }
  0x97   :  { %v354_v24 = vmax.f32 %v326_v41, 0.0  ;;  %v353_v20 = vmax.f32 %v325_v43, 0.0  ;;  %v356_v22 = vmax.f32 %v328_v8, 0.0  ;;  %v365_v23 = vmax.f32 %v337_v7, 0.0 }
  0x98   :  { %v2184_v31 = vpop.permute.xlu1 %318  ;;  %v327_v11 = vadd.f32 %v2174_v55, %v283_v26  ;;  %v334_v12 = vadd.f32 %v2172_v1, %v290_v27  ;;  %v358_v57 = vmax.f32 %v330_v9, 0.0  ;;  %v329_v29 = vadd.f32 %v2174_v55, %v285_v30 }
  0x99   :  { %v421_v52 = vpack.c.bf16 %v361_v13, %v354_v24  ;;  %v420_v16 = vpack.c.bf16 %v360_v14, %v353_v20  ;;  %v340_v17 = vadd.f32 %v2184_v31, %v296_v3  ;;  %v339_v28 = vadd.f32 %v2184_v31, %v295_v38 }
  0x9a   :  { %v336_v34 = vadd.f32 %v2172_v1, %v292_v33  ;;  %v307_v51 = vadd.f32 %v279_v56, %v172_v53  ;;  %v276_v26 = vmul.f32 %v2079_v45, %v2127_v54  ;;  %v271_v27 = vmul.f32 %v2081_v47, %v2122_v32 }
  0x9b   :  { %481 = vmatprep.subr.bf16.mxu0 %v421_v52  ;;  %1927 = vmatprep.subr.bf16.mxu1 %v421_v52  ;;  %v423_v33 = vpack.c.bf16 %v363_v25, %v356_v22  ;;  %v355_v53 = vmax.f32 %v327_v11, 0.0  ;;  %v362_v0 = vmax.f32 %v334_v12, 0.0  ;;  %v278_v45 = vmul.f32 %v2081_v47, %v2127_v54 }
  0x9c   :  { %v2203_v30 = vpop.permute.xlu1 %322  ;;  %482 = vmatpush1.bf16.msra.mxu0 %v420_v16  ;;  %1929 = vmatpush1.bf16.msra.mxu1 %v420_v16  ;;  %v368_v56 = vmax.f32 %v340_v17, 0.0  ;;  %v425_v38 = vpack.c.bf16 %v365_v23, %v358_v57  ;;  %v367_v48 = vmax.f32 %v339_v28, 0.0  ;;  %v357_v6 = vmax.f32 %v329_v29, 0.0 }
  0x9d   :  { %v347_v39 = vadd.f32 %v2203_v30, %v303_v18  ;;  %v346_v3 = vadd.f32 %v2203_v30, %v302_v19  ;;  %v364_v35 = vmax.f32 %v336_v34, 0.0  ;;  %v349_v37 = vadd.f32 %v2203_v30, %v305_v21 }
  0x9e   :  { %v351_v43 = vadd.f32 %v2203_v30, %v307_v51  ;;  %v304_v8 = vadd.f32 %v276_v26, %v2141_v59  ;;  %v422_v9 = vpack.c.bf16 %v362_v0, %v355_v53  ;;  %v342_v47 = vadd.f32 %v2184_v31, %v298_v4  ;;  %v2222_v59 = vld [vmem:[%s3374_s2] sm:$0xff]  }
  0x9f   :  { %v375_v7 = vmax.f32 %v347_v39, 0.0  ;;  %v374_v41 = vmax.f32 %v346_v3, 0.0  ;;  %v344_v13 = vadd.f32 %v2184_v31, %v300_v5  ;;  %v306_v14 = vadd.f32 %v278_v45, %v2147_v60  ;;  %v2227_v60 = vld [vmem:[%s3374_s2 + $0x28] ss:$0 sps:$4 sm:$0xff]   ;;  %v1960_v3 = vld [vmem:[%s3374_s2 + $0x20] sm:$0xff]  }
  0xa0   :  { %v297_v24 = vadd.f32 %v269_v36, %v2138_v40  ;;  %v348_v20 = vadd.f32 %v2203_v30, %v304_v8  ;;  %v424_v25 = vpack.c.bf16 %v364_v35, %v357_v6  ;;  %v377_v21 = vmax.f32 %v349_v37, 0.0 }
  0xa1   :  { %v428_v18 = vpack.c.bf16 %v375_v7, %v368_v56  ;;  %v427_v19 = vpack.c.bf16 %v374_v41, %v367_v48  ;;  %v299_v22 = vadd.f32 %v271_v27, %v2144_v42  ;;  %v350_v23 = vadd.f32 %v2203_v30, %v306_v14  ;;  %v1958_v56 = vld [vmem:[%s3374_s2 + $0x10] sm:$0xff]  }
  0xa2   :  { %v379_v40 = vmax.f32 %v351_v43, 0.0  ;;  %v341_v4 = vadd.f32 %v2184_v31, %v297_v24  ;;  %v287_v42 = vadd.f32 %v2159_v63, %v2152_v61  ;;  %v294_v5 = vadd.f32 %v2162_v44, %v2155_v62 }
  0xa3   :  { %483 = vmatprep.subr.bf16.mxu0 %v428_v18  ;;  %1928 = vmatprep.subr.bf16.mxu1 %v428_v18  ;;  %v370_v11 = vmax.f32 %v342_v47, 0.0  ;;  %v343_v12 = vadd.f32 %v2184_v31, %v299_v22  ;;  %v166_v52 = vmul.f32 %v2085_v49, %v2109_v10  ;;  %v273_v16 = vmul.f32 %v2087_v50, %v2122_v32 }
  0xa4   :  { %484 = vmatpush1.bf16.msra.mxu0 %v427_v19  ;;  %1930 = vmatpush1.bf16.msra.mxu1 %v427_v19  ;;  %v372_v17 = vmax.f32 %v344_v13, 0.0  ;;  %v376_v57 = vmax.f32 %v348_v20, 0.0  ;;  %v331_v61 = vadd.f32 %v2174_v55, %v287_v42  ;;  %v338_v63 = vadd.f32 %v2172_v1, %v294_v5 }
  0xa5   :  { %572 = vmatprep.subr.bf16.mxu1 %v423_v33  ;;  %663 = vmatprep.subr.bf16.mxu0 %v425_v38  ;;  %v378_v62 = vmax.f32 %v350_v23, 0.0  ;;  %v173_v44 = vmul.f32 %v2085_v49, %v2114_v15  ;;  %v280_v28 = vmul.f32 %v2087_v50, %v2127_v54  ;;  %v301_v29 = vadd.f32 %v273_v16, %v166_v52 }
  0xa6   :  { %v430_v10 = vpack.c.bf16 %v377_v21, %v370_v11  ;;  %v432_v32 = vpack.c.bf16 %v379_v40, %v372_v17  ;;  %v359_v34 = vmax.f32 %v331_v61, 0.0  ;;  %v366_v55 = vmax.f32 %v338_v63, 0.0 }
  0xa7   :  { %1849 = vmatmul.mubr.msk.bf16.vlgmr.msra.gmra.mrb[0].mxu0 %vm462_vm1, %v2222_v59  ;;  %1854 = vmatmul.mubr.msk.bf16.vlgmr.msra.gmra.mrb[0].mxu1 %vm462_vm1, %v2227_v60  ;;  %v369_v1 = vmax.f32 %v341_v4, 0.0  ;;  %v371_v51 = vmax.f32 %v343_v12, 0.0  ;;  %v308_v36 = vadd.f32 %v280_v28, %v173_v44  ;;  %v345_v49 = vadd.f32 %v2184_v31, %v301_v29  ;;  %v1957_v31 = vld [vmem:[%s3374_s2 + $0x8] sm:$0xff]  }
  0xa8   :  { %573 = vmatpush1.bf16.msra.mxu1 %v422_v9  ;;  %664 = vmatpush1.bf16.msra.mxu0 %v424_v25  ;;  %v387_v50 = vmul.f32 %v2201_v46, %v359_v34  ;;  %v394_v15 = vmul.f32 %v2201_v46, %v366_v55 }
  0xa9   :  { %574 = vmatprep.subr.bf16.mxu1 %v430_v10  ;;  %665 = vmatprep.subr.bf16.mxu0 %v432_v32  ;;  %v429_v54 = vpack.c.bf16 %v376_v57, %v369_v1  ;;  %v431_v26 = vpack.c.bf16 %v378_v62, %v371_v51  ;;  %v352_v27 = vadd.f32 %v2203_v30, %v308_v36  ;;  %v373_v33 = vmax.f32 %v345_v49, 0.0 }
  0xaa   :  { %523 = vmatprep.mubr.bf16.mxu0 %v3377_v2  ;;  %604 = vmatprep.mubr.bf16.mxu1 %v3377_v2  ;;  %v426_v53 = vpack.c.bf16 %v394_v15, %v387_v50 }
  0xab   :  { %v380_v0 = vmax.f32 %v352_v27, 0.0  ;;  %v401_v45 = vmul.f32 %v2201_v46, %v373_v33 }
  0xac   :  { %575 = vmatpush1.bf16.msra.mxu1 %v429_v54  ;;  %666 = vmatpush1.bf16.msra.mxu0 %v431_v26 }
  0xad   :  { %1895 = vmatprep.subr.bf16.mxu1 %v426_v53  ;;  %v408_v39 = vmul.f32 %v2201_v46, %v380_v0  ;;  %v1959_v46 = vld [vmem:[%s3374_s2 + $0x18] sm:$0xff]  }
  0xaf   :  { %1850 = vmatmul.mubr.msk.bf16.gmra.mrb[4].mxu0 %vm462_vm1, %v1957_v31  ;;  %1855 = vmatmul.mubr.msk.bf16.vlgmr.msra.gmra.mrb[4].mxu1 %vm462_vm1, %v2222_v59  ;;  %v433_v30 = vpack.c.bf16 %v408_v39, %v401_v45 }
  0xb0   :  { %1896 = vmatpush3.bf16.msra.mxu1 %v426_v53  ;;  %533 = vmatprep.mubr.bf16.mxu0 %v3377_v2 }
  0xb1   :  { %614 = vmatprep.mubr.bf16.mxu1 %v3377_v2  ;;  %1897 = vmatprep.subr.bf16.mxu1 %v433_v30 }
  0xb4   :  { %1898 = vmatpush3.bf16.msra.mxu1 %v433_v30 }
  0xb7   :  { %1851 = vmatmul.mubr.msk.bf16.gmra.mrb[8].mxu0 %vm462_vm1, %v1958_v56  ;;  %1856 = vmatmul.mubr.msk.bf16.gmra.mrb[8].mxu1 %vm462_vm1, %v1957_v31 }
  0xb8   :  { %543 = vmatprep.mubr.bf16.mxu0 %v3377_v2  ;;  %624 = vmatprep.mubr.bf16.mxu1 %v3377_v2 }
  0xbf   :  { %1852 = vmatmul.mubr.msk.bf16.gmra.mrb[12].mxu0 %vm462_vm1, %v1959_v46  ;;  %1857 = vmatmul.mubr.msk.bf16.gmra.mrb[12].mxu1 %vm462_vm1, %v1958_v56 }
  0xc0   :  { %553 = vmatprep.mubr.bf16.mxu0 %v3377_v2  ;;  %634 = vmatprep.mubr.bf16.mxu1 %v3377_v2 }
  0xc7   :  { %1853 = vmatmul.mubr.msk.bf16.gmra.mrb[16].mxu0 %vm462_vm1, %v1960_v3  ;;  %1858 = vmatmul.mubr.msk.bf16.gmra.mrb[16].mxu1 %vm462_vm1, %v1959_v46 }
  0xc8   :  { %644 = vmatprep.mubr.bf16.mxu1 %v3377_v2  ;;  %695 = vmatprep.mubr.bf16.mxu0 %v3377_v2 }
  0xcf   :  { %1859 = vmatmul.mubr.msk.bf16.gmra.mrb[20].mxu1 %vm462_vm1, %v1960_v3  ;;  %1861 = vmatmul.mubr.msk.bf16.vlgmr.msra.gmra.mrb[20].mxu0 %vm462_vm1, %v2222_v59 }
  0xd0   :  { %654 = vmatprep.mubr.bf16.mxu1 %v3377_v2  ;;  %705 = vmatprep.mubr.bf16.mxu0 %v3377_v2 }
  0xd7   :  { %1860 = vmatmul.mubr.msk.bf16.gmra.mrb[24].mxu1 %vm462_vm1, %v2227_v60  ;;  %1862 = vmatmul.mubr.msk.bf16.gmra.mrb[24].mxu0 %vm462_vm1, %v1957_v31 }
  0xd8   :  { %715 = vmatprep.mubr.bf16.mxu0 %v3377_v2  ;;  %1899 = vmatprep.mubr.msk.bf16.mxu1 %vm462_vm1, %v2222_v59 }
  0xdf   :  { %1863 = vmatmul.mubr.msk.bf16.gmra.mrb[28].mxu0 %vm462_vm1, %v1958_v56  ;;  %1900 = vmatmul.mubr.msk.bf16.vlgmr.msra.gmra.mrb[28].mxu1 %vm462_vm1, %v1957_v31 }
  0xe0   :  { %725 = vmatprep.mubr.bf16.mxu0 %v3377_v2  ;;  %1903 = vmatprep.mubr.msk.bf16.mxu1 %vm462_vm1, %v1958_v56 }
  0xe7   :  { %1864 = vmatmul.mubr.msk.bf16.gmra.mrb[32].mxu0 %vm462_vm1, %v1959_v46  ;;  %1904 = vmatmul.mubr.msk.bf16.gmra.mrb[32].mxu1 %vm462_vm1, %v1959_v46 }
  0xe8   :  { %735 = vmatprep.mubr.bf16.mxu0 %v3377_v2  ;;  %1907 = vmatprep.mubr.msk.bf16.mxu1 %vm462_vm1, %v1960_v3 }
  0xef   :  { %1865 = vmatmul.mubr.msk.bf16.gmra.mrb[36].mxu0 %vm462_vm1, %v1960_v3  ;;  %1908 = vmatmul.mubr.msk.bf16.gmra.mrb[36].mxu1 %vm462_vm1, %v2227_v60 }
  0xf0   :  { %745 = vmatprep.mubr.bf16.mxu0 %v3377_v2  ;;  %1683 = vmatprep.mubr.bf16.mxu1 %v3377_v2 }
  0xf7   :  { %1866 = vmatmul.mubr.msk.bf16.gmra.mrb[40].mxu0 %vm462_vm1, %v2227_v60 }
  0xf8   :  { %1724 = vmatprep.mubr.bf16.mxu0 %v3377_v2 }
 0x17a   :  { %v2313_v38 = vpop.f32.mrb[0].mxu1  ;;  %v2315_v48 = vpop.f32.mrb[0].mxu0 }
 0x17b   :  { %3432 = vst [vmem:[#allocation5_spill] sm:$0xff] %v2313_v38  ;;  %v992_v6 = vmul.f32 %v2313_v38, %v2313_v38  ;;  %v2319_v35 = vpop.f32.mrb[1].mxu1  ;;  %v922_v37 = vmul.f32 %v2315_v48, %v2315_v48  ;;  %v2323_v7 = vpop.f32.mrb[1].mxu0 }
 0x17c   :  { %3433 = vst [vmem:[#allocation6_spill] sm:$0xff] %v2319_v35  ;;  %v2327_v41 = vadd.f32 %v2319_v35, %v2313_v38  ;;  %v993_v43 = vmul.f32 %v2319_v35, %v2319_v35  ;;  %v569_v8 = vpop.f32.mrb[2].mxu1  ;;  %v834_v9 = vadd.f32 %v2323_v7, %v2315_v48  ;;  %v923_v47 = vmul.f32 %v2323_v7, %v2323_v7  ;;  %v2335_v13 = vpop.f32.mrb[2].mxu0 }
 0x17d   :  { %v570_v14 = vpop.f32.mrb[3].mxu1  ;;  %v929_v18 = vmul.f32 %v2335_v13, %v2335_v13  ;;  %v2339_v19 = vpop.f32.mrb[3].mxu0 }
 0x17e   :  { %v2341_v24 = vadd.f32 %v993_v43, %v992_v6  ;;  %v999_v20 = vadd.f32 %v923_v47, %v922_v37  ;;  %v842_v25 = vadd.f32 %v2339_v19, %v2335_v13  ;;  %v930_v21 = vmul.f32 %v2339_v19, %v2339_v19 }
 0x180   :  { %v1007_v22 = vadd.f32 %v930_v21, %v929_v18 }
 0x182   :  { %v2347_v23 = vpop.f32.mrb[4].mxu1  ;;  %v2349_v59 = vpop.f32.mrb[4].mxu0 }
 0x183   :  { %v835_v60 = vadd.f32 %v834_v9, %v2347_v23  ;;  %v924_v40 = vmul.f32 %v2347_v23, %v2347_v23  ;;  %v2354_v4 = vpop.f32.mrb[5].mxu1  ;;  %v936_v42 = vmul.f32 %v2349_v59, %v2349_v59  ;;  %v2358_v5 = vpop.f32.mrb[5].mxu0 }
 0x184   :  { %v925_v11 = vmul.f32 %v2354_v4, %v2354_v4  ;;  %v2362_v12 = vpop.f32.mrb[6].mxu1  ;;  %v850_v52 = vadd.f32 %v2358_v5, %v2349_v59  ;;  %v937_v16 = vmul.f32 %v2358_v5, %v2358_v5  ;;  %v2368_v17 = vpop.f32.mrb[6].mxu0 }
 0x185   :  { %v1000_v57 = vadd.f32 %v999_v20, %v924_v40  ;;  %v2371_v61 = vadd.f32 %v835_v60, %v2354_v4  ;;  %v843_v63 = vadd.f32 %v842_v25, %v2362_v12  ;;  %v931_v62 = vmul.f32 %v2362_v12, %v2362_v12  ;;  %v2376_v44 = vpop.f32.mrb[7].mxu1  ;;  %v2378_v28 = vpop.f32.mrb[7].mxu0 }
 0x186   :  { %v932_v29 = vmul.f32 %v2376_v44, %v2376_v44  ;;  %v1015_v10 = vadd.f32 %v937_v16, %v936_v42  ;;  %v943_v32 = vmul.f32 %v2368_v17, %v2368_v17  ;;  %v858_v34 = vadd.f32 %v2378_v28, %v2368_v17 }
 0x187   :  { %v2386_v55 = vadd.f32 %v1000_v57, %v925_v11  ;;  %v1008_v1 = vadd.f32 %v1007_v22, %v931_v62  ;;  %v2389_v51 = vadd.f32 %v843_v63, %v2376_v44  ;;  %v944_v36 = vmul.f32 %v2378_v28, %v2378_v28 }
 0x189   :  { %v2393_v49 = vadd.f32 %v1008_v1, %v932_v29  ;;  %v1023_v50 = vadd.f32 %v944_v36, %v943_v32 }
 0x18a   :  { %v2395_v15 = vpop.f32.mrb[8].mxu1  ;;  %v2397_v54 = vpop.f32.mrb[8].mxu0 }
 0x18b   :  { %3434 = vst [vmem:[#allocation7_spill] sm:$0xff] %v2397_v54  ;;  %v851_v26 = vadd.f32 %v850_v52, %v2395_v15  ;;  %v938_v27 = vmul.f32 %v2395_v15, %v2395_v15  ;;  %v2402_v33 = vpop.f32.mrb[9].mxu1  ;;  %v950_v53 = vmul.f32 %v2397_v54, %v2397_v54  ;;  %v2406_v31 = vpop.f32.mrb[9].mxu0 }
 0x18c   :  { %v939_v0 = vmul.f32 %v2402_v33, %v2402_v33  ;;  %v2410_v45 = vpop.f32.mrb[10].mxu1  ;;  %v866_v39 = vadd.f32 %v2406_v31, %v2397_v54  ;;  %v951_v30 = vmul.f32 %v2406_v31, %v2406_v31  ;;  %v2416_v56 = vpop.f32.mrb[10].mxu0 }
 0x18d   :  { %3435 = vst [vmem:[#allocation8_spill] sm:$0xff] %v2416_v56  ;;  %v1016_v46 = vadd.f32 %v1015_v10, %v938_v27  ;;  %v2419_v3 = vadd.f32 %v851_v26, %v2402_v33  ;;  %v859_v6 = vadd.f32 %v858_v34, %v2410_v45  ;;  %v945_v37 = vmul.f32 %v2410_v45, %v2410_v45  ;;  %v2424_v43 = vpop.f32.mrb[11].mxu1  ;;  %v2426_v8 = vpop.f32.mrb[11].mxu0 }
 0x18e   :  { %3436 = vst [vmem:[#allocation9_spill] sm:$0xff] %v2426_v8  ;;  %v946_v9 = vmul.f32 %v2424_v43, %v2424_v43  ;;  %v1031_v47 = vadd.f32 %v951_v30, %v950_v53  ;;  %v957_v14 = vmul.f32 %v2416_v56, %v2416_v56  ;;  %v874_v18 = vadd.f32 %v2426_v8, %v2416_v56 }
 0x18f   :  { %v2434_v20 = vadd.f32 %v1016_v46, %v939_v0  ;;  %v1024_v25 = vadd.f32 %v1023_v50, %v945_v37  ;;  %v2437_v21 = vadd.f32 %v859_v6, %v2424_v43  ;;  %v958_v22 = vmul.f32 %v2426_v8, %v2426_v8 }
 0x191   :  { %v2441_v60 = vadd.f32 %v1024_v25, %v946_v9  ;;  %v1039_v40 = vadd.f32 %v958_v22, %v957_v14 }
 0x192   :  { %v2443_v42 = vpop.f32.mrb[12].mxu1  ;;  %v2445_v11 = vpop.f32.mrb[12].mxu0 }
 0x193   :  { %3437 = vst [vmem:[#allocation10_spill] sm:$0xff] %v2443_v42  ;;  %3438 = vst [vmem:[#allocation11_spill] sm:$0xff] %v2445_v11  ;;  %v867_v52 = vadd.f32 %v866_v39, %v2443_v42  ;;  %v952_v16 = vmul.f32 %v2443_v42, %v2443_v42  ;;  %v2450_v57 = vpop.f32.mrb[13].mxu1  ;;  %v964_v63 = vmul.f32 %v2445_v11, %v2445_v11  ;;  %v2454_v62 = vpop.f32.mrb[13].mxu0 }
 0x194   :  { %3439 = vst [vmem:[#allocation12_spill] sm:$0xff] %v2450_v57  ;;  %3440 = vst [vmem:[#allocation13_spill] sm:$0xff] %v2454_v62  ;;  %v953_v29 = vmul.f32 %v2450_v57, %v2450_v57  ;;  %v2458_v10 = vpop.f32.mrb[14].mxu1  ;;  %v882_v32 = vadd.f32 %v2454_v62, %v2445_v11  ;;  %v965_v34 = vmul.f32 %v2454_v62, %v2454_v62  ;;  %v2464_v1 = vpop.f32.mrb[14].mxu0 }
 0x195   :  { %3441 = vst [vmem:[#allocation14_spill] sm:$0xff] %v2458_v10  ;;  %3442 = vst [vmem:[#allocation15_spill] sm:$0xff] %v2464_v1  ;;  %v1032_v36 = vadd.f32 %v1031_v47, %v952_v16  ;;  %v2467_v50 = vadd.f32 %v867_v52, %v2450_v57  ;;  %v875_v26 = vadd.f32 %v874_v18, %v2458_v10  ;;  %v2472_v53 = vpop.f32.mrb[15].mxu1  ;;  %v2474_v0 = vpop.f32.mrb[15].mxu0 }
 0x196   :  { %v959_v27 = vmul.f32 %v2458_v10, %v2458_v10  ;;  %3443 = vst [vmem:[#allocation16_spill] sm:$0xff] %v2472_v53  ;;  %3444 = vst [vmem:[#allocation17_spill] sm:$0xff] %v2474_v0  ;;  %v960_v39 = vmul.f32 %v2472_v53, %v2472_v53  ;;  %v1047_v30 = vadd.f32 %v965_v34, %v964_v63 }
 0x197   :  { %v971_v46 = vmul.f32 %v2464_v1, %v2464_v1  ;;  %v890_v6 = vadd.f32 %v2474_v0, %v2464_v1  ;;  %v2482_v37 = vadd.f32 %v1032_v36, %v953_v29  ;;  %v2485_v47 = vadd.f32 %v875_v26, %v2472_v53 }
 0x198   :  { %v1040_v9 = vadd.f32 %v1039_v40, %v959_v27  ;;  %v972_v14 = vmul.f32 %v2474_v0, %v2474_v0 }
 0x19a   :  { %v2489_v18 = vadd.f32 %v1040_v9, %v960_v39  ;;  %v1055_v25 = vadd.f32 %v972_v14, %v971_v46  ;;  %v2491_v22 = vpop.f32.mrb[16].mxu1  ;;  %v2493_v52 = vpop.f32.mrb[16].mxu0 }
 0x19b   :  { %3445 = vst [vmem:[#allocation18_spill] sm:$0xff] %v2491_v22  ;;  %3446 = vst [vmem:[#allocation19_spill] sm:$0xff] %v2493_v52  ;;  %v883_v16 = vadd.f32 %v882_v32, %v2491_v22  ;;  %v966_v63 = vmul.f32 %v2491_v22, %v2491_v22  ;;  %v2498_v29 = vpop.f32.mrb[17].mxu1  ;;  %v978_v40 = vmul.f32 %v2493_v52, %v2493_v52  ;;  %v2502_v34 = vpop.f32.mrb[17].mxu0 }
 0x19c   :  { %3447 = vst [vmem:[#allocation20_spill] sm:$0xff] %v2498_v29  ;;  %3448 = vst [vmem:[#allocation21_spill] sm:$0xff] %v2502_v34  ;;  %v967_v36 = vmul.f32 %v2498_v29, %v2498_v29  ;;  %v2506_v26 = vpop.f32.mrb[18].mxu1  ;;  %v898_v27 = vadd.f32 %v2502_v34, %v2493_v52  ;;  %v979_v32 = vmul.f32 %v2502_v34, %v2502_v34  ;;  %v2512_v39 = vpop.f32.mrb[18].mxu0 }
 0x19d   :  { %3449 = vst [vmem:[#allocation22_spill] sm:$0xff] %v2506_v26  ;;  %3450 = vst [vmem:[#allocation23_spill] sm:$0xff] %v2512_v39  ;;  %v1048_v46 = vadd.f32 %v1047_v30, %v966_v63  ;;  %v2515_v9 = vadd.f32 %v883_v16, %v2498_v29  ;;  %v891_v14 = vadd.f32 %v890_v6, %v2506_v26  ;;  %v2520_v58 = vpop.f32.mrb[19].mxu1  ;;  %v2522_v38 = vpop.f32.mrb[19].mxu0 }
 0x19e   :  { %v973_v2 = vmul.f32 %v2506_v26, %v2506_v26  ;;  %3451 = vst [vmem:[#allocation24_spill] sm:$0xff] %v2520_v58  ;;  %3452 = vst [vmem:[#allocation25_spill] sm:$0xff] %v2522_v38  ;;  %v974_v35 = vmul.f32 %v2520_v58, %v2520_v58  ;;  %v1063_v52 = vadd.f32 %v979_v32, %v978_v40 }
 0x19f   :  { %v985_v34 = vmul.f32 %v2512_v39, %v2512_v39  ;;  %v906_v30 = vadd.f32 %v2522_v38, %v2512_v39  ;;  %v2530_v16 = vadd.f32 %v1048_v46, %v967_v36  ;;  %v2533_v63 = vadd.f32 %v891_v14, %v2520_v58 }
 0x1a0   :  { %v1056_v6 = vadd.f32 %v1055_v25, %v973_v2  ;;  %v986_v22 = vmul.f32 %v2522_v38, %v2522_v38 }
 0x1a2   :  { %v2537_v11 = vadd.f32 %v1056_v6, %v974_v35  ;;  %v1071_v29 = vadd.f32 %v986_v22, %v985_v34  ;;  %v2539_v62 = vpop.f32.mrb[20].mxu1  ;;  %v2541_v40 = vpop.f32.mrb[20].mxu0 }
 0x1a3   :  { %3453 = vst [vmem:[#allocation26_spill] sm:$0xff] %v2539_v62  ;;  %v899_v32 = vadd.f32 %v898_v27, %v2539_v62  ;;  %v980_v36 = vmul.f32 %v2539_v62, %v2539_v62  ;;  %v837_v2 = vadd.f32 %v2371_v61, %v2541_v40  ;;  %v2548_v25 = vpop.f32.mrb[21].mxu1  ;;  %v2550_v46 = vpop.f32.mrb[21].mxu0  ;;  %v926_v35 = vmul.f32 %v2541_v40, %v2541_v40 }
 0x1a4   :  { %3454 = vst [vmem:[#allocation27_spill] sm:$0xff] %v2548_v25  ;;  %v981_v22 = vmul.f32 %v2548_v25, %v2548_v25  ;;  %v927_v34 = vmul.f32 %v2550_v46, %v2550_v46  ;;  %v2558_v27 = vpop.f32.mrb[22].mxu1  ;;  %v2560_v14 = vpop.f32.mrb[22].mxu0 }
 0x1a5   :  { %3455 = vst [vmem:[#allocation28_spill] sm:$0xff] %v2558_v27  ;;  %v1064_v6 = vadd.f32 %v1063_v52, %v980_v36  ;;  %v2563_v61 = vadd.f32 %v899_v32, %v2548_v25  ;;  %v907_v39 = vadd.f32 %v906_v30, %v2558_v27  ;;  %v987_v38 = vmul.f32 %v2558_v27, %v2558_v27  ;;  %v2568_v62 = vpop.f32.mrb[23].mxu1  ;;  %v2570_v26 = vpop.f32.mrb[23].mxu0 }
 0x1a6   :  { %3456 = vst [vmem:[#allocation29_spill] sm:$0xff] %v2568_v62  ;;  %v845_v1 = vadd.f32 %v2389_v51, %v2560_v14  ;;  %v933_v58 = vmul.f32 %v2560_v14, %v2560_v14  ;;  %v988_v52 = vmul.f32 %v2568_v62, %v2568_v62  ;;  %v934_v32 = vmul.f32 %v2570_v26, %v2570_v26 }
 0x1a7   :  { %v2580_v30 = vadd.f32 %v1064_v6, %v981_v22  ;;  %v1072_v36 = vadd.f32 %v1071_v29, %v987_v38  ;;  %v2583_v27 = vadd.f32 %v907_v39, %v2568_v62  ;;  %v838_v25 = vadd.f32 %v837_v2, %v2550_v46 }
 0x1a8   :  { %v846_v0 = vadd.f32 %v845_v1, %v2570_v26  ;;  %v1002_v51 = vadd.f32 %v2386_v55, %v926_v35  ;;  %v1010_v10 = vadd.f32 %v2393_v49, %v933_v58 }
 0x1a9   :  { %v2589_v56 = vadd.f32 %v1072_v36, %v988_v52 }
 0x1aa   :  { %v2591_v53 = vpop.f32.mrb[24].mxu1  ;;  %v2593_v8 = vpop.f32.mrb[24].mxu0  ;;  %v1003_v22 = vadd.f32 %v1002_v51, %v927_v34  ;;  %v1011_v6 = vadd.f32 %v1010_v10, %v934_v32 }
 0x1ab   :  { %3457 = vst [vmem:[#allocation30_spill] sm:$0xff] %v2591_v53  ;;  %3458 = vst [vmem:[#allocation31_spill] sm:$0xff] %v2593_v8  ;;  %v915_v38 = vadd.f32 %v2327_v41, %v2591_v53  ;;  %v994_v29 = vmul.f32 %v2591_v53, %v2591_v53  ;;  %v853_v1 = vadd.f32 %v2419_v3, %v2593_v8  ;;  %v2603_v55 = vpop.f32.mrb[25].mxu1  ;;  %v2605_v49 = vpop.f32.mrb[25].mxu0 }
 0x1ac   :  { %v940_v58 = vmul.f32 %v2593_v8, %v2593_v8  ;;  %3459 = vst [vmem:[#allocation32_spill] sm:$0xff] %v2603_v55  ;;  %3460 = vst [vmem:[#allocation33_spill] sm:$0xff] %v2605_v49  ;;  %v995_v39 = vmul.f32 %v2603_v55, %v2603_v55  ;;  %v941_v10 = vmul.f32 %v2605_v49, %v2605_v49  ;;  %v660_v41 = vpop.f32.mrb[26].mxu1  ;;  %v2611_v2 = vpop.f32.mrb[26].mxu0 }
 0x1ad   :  { %v1080_v35 = vadd.f32 %v2341_v24, %v994_v29  ;;  %v2615_v3 = vadd.f32 %v915_v38, %v2603_v55  ;;  %v861_v34 = vadd.f32 %v2437_v21, %v2611_v2  ;;  %v947_v52 = vmul.f32 %v2611_v2, %v2611_v2  ;;  %v661_v32 = vpop.f32.mrb[27].mxu1  ;;  %v2621_v36 = vpop.f32.mrb[27].mxu0 }
 0x1ae   :  { %v948_v51 = vmul.f32 %v2621_v36, %v2621_v36  ;;  %v854_v41 = vadd.f32 %v853_v1, %v2605_v49  ;;  %v1018_v53 = vadd.f32 %v2434_v20, %v940_v58 }
 0x1af   :  { %v2627_v24 = vadd.f32 %v1080_v35, %v995_v39  ;;  %v862_v38 = vadd.f32 %v861_v34, %v2621_v36  ;;  %v1026_v29 = vadd.f32 %v2441_v60, %v947_v52 }
 0x1b0   :  { %v1019_v21 = vadd.f32 %v1018_v53, %v941_v10 }
 0x1b1   :  { %v1027_v55 = vadd.f32 %v1026_v29, %v948_v51 }
 0x1b2   :  { %v2631_v62 = vpop.f32.mrb[28].mxu0  ;;  %v2633_v32 = vpop.f32.mrb[28].mxu1 }
 0x1b3   :  { %3461 = vst [vmem:[#allocation34_spill] sm:$0xff] %v2631_v62  ;;  %3462 = vst [vmem:[#allocation35_spill] sm:$0xff] %v2633_v32  ;;  %v869_v8 = vadd.f32 %v2467_v50, %v2631_v62  ;;  %v954_v1 = vmul.f32 %v2631_v62, %v2631_v62  ;;  %v2639_v49 = vpop.f32.mrb[29].mxu0  ;;  %v2641_v20 = vpop.f32.mrb[29].mxu1  ;;  %v855_v58 = vadd.f32 %v2633_v32, %v854_v41 }
 0x1b4   :  { %v942_v60 = vmul.f32 %v2633_v32, %v2633_v32  ;;  %v955_v53 = vmul.f32 %v2639_v49, %v2639_v49  ;;  %v2648_v39 = vpop.f32.mrb[30].mxu0  ;;  %v2650_v10 = vpop.f32.mrb[30].mxu1  ;;  %v839_v50 = vadd.f32 %v838_v25, %v2641_v20  ;;  %v928_v35 = vmul.f32 %v2641_v20, %v2641_v20 }
 0x1b5   :  { %3463 = vst [vmem:[#allocation36_spill] sm:$0xff] %v2648_v39  ;;  %v877_v34 = vadd.f32 %v2485_v47, %v2648_v39  ;;  %v961_v52 = vmul.f32 %v2648_v39, %v2648_v39  ;;  %v2659_v51 = vpop.f32.mrb[31].mxu1  ;;  %856 = vadd.xlane.f32.xlu1 %v855_v58  ;;  %v2661_v41 = vpop.f32.mrb[31].mxu0  ;;  %v863_v62 = vadd.f32 %v2650_v10, %v862_v38 }
 0x1b6   :  { %3464 = vst [vmem:[#allocation37_spill] sm:$0xff] %v2661_v41  ;;  %v1020_v29 = vadd.f32 %v1019_v21, %v942_v60  ;;  %840 = vadd.xlane.f32.xlu0 %v839_v50  ;;  %v962_v25 = vmul.f32 %v2661_v41, %v2661_v41  ;;  %v847_v32 = vadd.f32 %v846_v0, %v2659_v51 }
 0x1b7   :  { %v1004_v42 = vadd.f32 %v1003_v22, %v928_v35  ;;  %v870_v47 = vadd.f32 %v869_v8, %v2639_v49  ;;  %v949_v39 = vmul.f32 %v2650_v10, %v2650_v10  ;;  %v1034_v54 = vadd.f32 %v2482_v37, %v954_v1 }
 0x1b8   :  { %v935_v58 = vmul.f32 %v2659_v51, %v2659_v51  ;;  %v878_v21 = vadd.f32 %v877_v34, %v2661_v41  ;;  %v1042_v38 = vadd.f32 %v2489_v18, %v961_v52 }
 0x1b9   :  { %1021 = vadd.xlane.f32.xlu1 %v1020_v29  ;;  %v1028_v60 = vadd.f32 %v1027_v55, %v949_v39  ;;  %v1035_v50 = vadd.f32 %v1034_v54, %v955_v53 }
 0x1ba   :  { %v1012_v57 = vadd.f32 %v1011_v6, %v935_v58  ;;  %v2675_v0 = vpop.f32.mrb[32].mxu1  ;;  %864 = vadd.xlane.f32.xlu0 %v863_v62  ;;  %v2677_v8 = vpop.f32.mrb[32].mxu0  ;;  %v1043_v22 = vadd.f32 %v1042_v38, %v962_v25 }
 0x1bb   :  { %3465 = vst [vmem:[#allocation38_spill] sm:$0xff] %v2675_v0  ;;  %3466 = vst [vmem:[#allocation39_spill] sm:$0xff] %v2677_v8  ;;  %v885_v37 = vadd.f32 %v2515_v9, %v2677_v8  ;;  %v968_v1 = vmul.f32 %v2677_v8, %v2677_v8  ;;  %v2683_v35 = vpop.f32.mrb[33].mxu0  ;;  %v2685_v34 = vpop.f32.mrb[33].mxu1  ;;  %v970_v9 = vmul.f32 %v2675_v0, %v2675_v0 }
 0x1bc   :  { %3467 = vst [vmem:[#allocation40_spill] sm:$0xff] %v2683_v35  ;;  %3468 = vst [vmem:[#allocation41_spill] sm:$0xff] %v2685_v34  ;;  %v969_v54 = vmul.f32 %v2683_v35, %v2683_v35  ;;  %v2689_v18 = vpop.f32.mrb[34].mxu0  ;;  %v2691_v6 = vpop.f32.mrb[34].mxu1  ;;  %v871_v62 = vadd.f32 %v870_v47, %v2685_v34  ;;  %v956_v55 = vmul.f32 %v2685_v34, %v2685_v34 }
 0x1bd   :  { %3469 = vst [vmem:[#allocation42_spill] sm:$0xff] %v2689_v18  ;;  %3470 = vst [vmem:[#allocation43_spill] sm:$0xff] %v2691_v6  ;;  %v893_v53 = vadd.f32 %v2533_v63, %v2689_v18  ;;  %v975_v39 = vmul.f32 %v2689_v18, %v2689_v18  ;;  %v2702_v52 = vpop.f32.mrb[35].mxu1  ;;  %848 = vadd.xlane.f32.xlu1 %v847_v32  ;;  %v2704_v29 = vpop.f32.mrb[35].mxu0  ;;  %v886_v25 = vadd.f32 %v885_v37, %v2683_v35 }
 0x1be   :  { %v1050_v47 = vadd.f32 %v2530_v16, %v968_v1  ;;  %1005 = vadd.xlane.f32.xlu0 %v1004_v42  ;;  %v976_v58 = vmul.f32 %v2704_v29, %v2704_v29  ;;  %v1036_v38 = vadd.f32 %v1035_v50, %v956_v55  ;;  %v879_v8 = vadd.f32 %v878_v21, %v2702_v52 }
 0x1bf   :  { %v963_v63 = vmul.f32 %v2702_v52, %v2702_v52  ;;  %v887_v18 = vadd.f32 %v2675_v0, %v886_v25  ;;  %v894_v32 = vadd.f32 %v893_v53, %v2704_v29  ;;  %v977_v37 = vmul.f32 %v2691_v6, %v2691_v6 }
 0x1c0   :  { %v1051_v41 = vadd.f32 %v1050_v47, %v969_v54  ;;  %v1058_v42 = vadd.f32 %v2537_v11, %v975_v39 }
 0x1c1   :  { %v1044_v34 = vadd.f32 %v1043_v22, %v963_v63  ;;  %872 = vadd.xlane.f32.xlu1 %v871_v62  ;;  %v895_v50 = vadd.f32 %v2691_v6, %v894_v32 }
 0x1c2   :  { %v1052_v16 = vadd.f32 %v1051_v41, %v970_v9  ;;  %1029 = vadd.xlane.f32.xlu0 %v1028_v60  ;;  %v2719_v21 = vpop.f32.mrb[36].mxu0  ;;  %v2721_v1 = vpop.f32.mrb[36].mxu1  ;;  %v1059_v55 = vadd.f32 %v1058_v42, %v976_v58 }
 0x1c3   :  { %3471 = vst [vmem:[#allocation44_spill] sm:$0xff] %v2719_v21  ;;  %3472 = vst [vmem:[#allocation45_spill] sm:$0xff] %v2721_v1  ;;  %v901_v54 = vadd.f32 %v2563_v61, %v2719_v21  ;;  %v982_v22 = vmul.f32 %v2719_v21, %v2719_v21  ;;  %v2727_v53 = vpop.f32.mrb[37].mxu0  ;;  %v2729_v25 = vpop.f32.mrb[37].mxu1 }
 0x1c4   :  { %3473 = vst [vmem:[#allocation46_spill] sm:$0xff] %v2727_v53  ;;  %3474 = vst [vmem:[#allocation47_spill] sm:$0xff] %v2729_v25  ;;  %v983_v11 = vmul.f32 %v2727_v53, %v2727_v53  ;;  %v2733_v41 = vpop.f32.mrb[38].mxu0  ;;  %v1910_v60 = vpop.f32.mrb[38].mxu1  ;;  %v984_v62 = vmul.f32 %v2729_v25, %v2729_v25  ;;  %v1060_v9 = vadd.f32 %v1059_v55, %v977_v37 }
 0x1c5   :  { %3475 = vst [vmem:[#allocation48_spill] sm:$0xff] %v2733_v41  ;;  %v909_v61 = vadd.f32 %v2583_v27, %v2733_v41  ;;  %v989_v39 = vmul.f32 %v2733_v41, %v2733_v41  ;;  %1037 = vadd.xlane.f32.xlu1 %v1036_v38  ;;  %v2741_v47 = vpop.f32.mrb[39].mxu0  ;;  %v2743_v58 = vpop.f32.mrb[39].mxu1  ;;  %v902_v63 = vadd.f32 %v901_v54, %v2727_v53 }
 0x1c6   :  { %3476 = vst [vmem:[#allocation49_spill] sm:$0xff] %v2741_v47  ;;  %3477 = vst [vmem:[#allocation50_spill] sm:$0xff] %v2743_v58  ;;  %v1066_v32 = vadd.f32 %v2580_v30, %v982_v22  ;;  %1013 = vadd.xlane.f32.xlu0 %v1012_v57  ;;  %v990_v42 = vmul.f32 %v2741_v47, %v2741_v47  ;;  %v991_v37 = vmul.f32 %v2743_v58, %v2743_v58 }
 0x1c7   :  { %v903_v27 = vadd.f32 %v902_v63, %v2729_v25  ;;  %v910_v38 = vadd.f32 %v909_v61, %v2741_v47  ;;  %v1074_v60 = vadd.f32 %v2589_v56, %v989_v39 }
 0x1c8   :  { %v1067_v55 = vadd.f32 %v1066_v32, %v983_v11 }
 0x1c9   :  { %888 = vadd.xlane.f32.xlu1 %v887_v18  ;;  %v911_v54 = vadd.f32 %v910_v38, %v2743_v58  ;;  %v1075_v21 = vadd.f32 %v1074_v60, %v990_v42 }
 0x1ca   :  { %v1068_v41 = vadd.f32 %v1067_v55, %v984_v62  ;;  %880 = vadd.xlane.f32.xlu0 %v879_v8  ;;  %v2755_v57 = vpop.f32.mrb[40].mxu0  ;;  %v998_v8 = vmul.f32 %v2721_v1, %v2721_v1 }
 0x1cb   :  { %3478 = vst [vmem:[#allocation51_spill] sm:$0xff] %v2755_v57  ;;  %v917_v30 = vadd.f32 %v2615_v3, %v2755_v57  ;;  %v996_v22 = vmul.f32 %v2755_v57, %v2755_v57  ;;  %v2761_v63 = vpop.f32.mrb[41].mxu0  ;;  %v1076_v11 = vadd.f32 %v1075_v21, %v991_v37 }
 0x1cc   :  { %3479 = vst [vmem:[#allocation52_spill] sm:$0xff] %v2761_v63  ;;  %v997_v56 = vmul.f32 %v2761_v63, %v2761_v63  ;;  %v751_v18 = vpop.f32.mrb[42].mxu0 }
 0x1cd   :  { %1053 = vadd.xlane.f32.xlu1 %v1052_v16  ;;  %v918_v62 = vadd.f32 %v917_v30, %v2761_v63  ;;  %v1082_v61 = vadd.f32 %v2627_v24, %v996_v22  ;;  %v752_v39 = vpop.f32.mrb[43].mxu0  ;;  %v3418_v16 = vmov 3  }
 0x1ce   :  { %1045 = vadd.xlane.f32.xlu0 %v1044_v34  ;;  %1947 = vset.pattern.permute.xlu1 %v3418_v16 }
 0x1cf   :  { %v919_v3 = vadd.f32 %v2721_v1, %v918_v62  ;;  %v1083_v32 = vadd.f32 %v1082_v61, %v997_v56  ;;  %1948 = vset.pattern.permute.xlu0 %v3418_v16 }
 0x1d1   :  { %904 = vadd.xlane.f32.xlu1 %v903_v27  ;;  %v1084_v42 = vadd.f32 %v1083_v32, %v998_v8 }
 0x1d2   :  { %896 = vadd.xlane.f32.xlu0 %v895_v50 }
 0x1d5   :  { %1069 = vadd.xlane.f32.xlu1 %v1068_v41 }
 0x1d6   :  { %1061 = vadd.xlane.f32.xlu0 %v1060_v9 }
 0x1d9   :  { %920 = vadd.xlane.f32.xlu1 %v919_v3 }
 0x1da   :  { %912 = vadd.xlane.f32.xlu0 %v911_v54 }
 0x1de   :  { %1077 = vadd.xlane.f32.xlu0 %v1076_v11 }
 0x1e2   :  { %1085 = vadd.xlane.f32.xlu0 %v1084_v42 }
 0x242   :  { %v857_v24 = vpop.xlane.xlu1 %856 }
 0x243   :  { %v2772_v21 = vmul.f32 0.0011534025, %v857_v24  ;;  %v841_v34 = vpop.xlane.xlu0 %840 }
 0x244   :  { %v1087_v9 = vmul.f32 0.0011534025, %v841_v34 }
 0x245   :  { %v1111_v27 = vmul.f32 %v2772_v21, %v2772_v21 }
 0x246   :  { %v1022_v37 = vpop.xlane.xlu1 %1021  ;;  %v1109_v30 = vmul.f32 %v1087_v9, %v1087_v9 }
 0x247   :  { %v1100_v50 = vmul.f32 0.0011534025, %v1022_v37  ;;  %v865_v41 = vpop.xlane.xlu0 %864 }
 0x248   :  { %v2776_v22 = vmul.f32 0.0011534025, %v865_v41 }
 0x249   :  { %v1122_v55 = vsub.f32 %v1100_v50, %v1111_v27 }
 0x24a   :  { %v849_v38 = vpop.xlane.xlu1 %848  ;;  %v1112_v39 = vmul.f32 %v2776_v22, %v2776_v22 }
 0x24b   :  { %v1133_v60 = vmax.f32 %v1122_v55, 0.0  ;;  %v1006_v54 = vpop.xlane.xlu0 %1005  ;;  %v2782_v3 = vmul.f32 0.0011534025, %v849_v38 }
 0x24c   :  { %v1098_v11 = vmul.f32 0.0011534025, %v1006_v54 }
 0x24d   :  { %v1144_v62 = vadd.f32 1e-05, %v1133_v60  ;;  %v1110_v55 = vmul.f32 %v2782_v3, %v2782_v3 }
 0x24e   :  { %v1120_v56 = vsub.f32 %v1098_v11, %v1109_v30  ;;  %v873_v18 = vpop.xlane.xlu1 %872 }
 0x24f   :  { %v2778_v8 = vmul.f32 0.0011534025, %v873_v18  ;;  %v1030_v61 = vpop.xlane.xlu0 %1029  ;;  %1961 = vrsqrt.f32 %v1144_v62 }
 0x250   :  { %v1131_v32 = vmax.f32 %v1120_v56, 0.0  ;;  %v1101_v42 = vmul.f32 0.0011534025, %v1030_v61 }
 0x251   :  { %v1113_v27 = vmul.f32 %v2778_v8, %v2778_v8 }
 0x252   :  { %v1142_v24 = vadd.f32 1e-05, %v1131_v32  ;;  %v1123_v34 = vsub.f32 %v1101_v42, %v1112_v39  ;;  %v1038_v37 = vpop.xlane.xlu1 %1037 }
 0x253   :  { %v1102_v50 = vmul.f32 0.0011534025, %v1038_v37  ;;  %v1014_v41 = vpop.xlane.xlu0 %1013 }
 0x254   :  { %1963 = vrsqrt.f32 %v1142_v24  ;;  %v1134_v60 = vmax.f32 %v1123_v34, 0.0  ;;  %v1099_v54 = vmul.f32 0.0011534025, %v1014_v41 }
 0x255   :  { %v1124_v30 = vsub.f32 %v1102_v50, %v1113_v27 }
 0x256   :  { %v1145_v38 = vadd.f32 1e-05, %v1134_v60  ;;  %v1121_v11 = vsub.f32 %v1099_v54, %v1110_v55  ;;  %v889_v56 = vpop.xlane.xlu1 %888 }
 0x257   :  { %v1135_v18 = vmax.f32 %v1124_v30, 0.0  ;;  %v2788_v61 = vmul.f32 0.0011534025, %v889_v56  ;;  %v881_v39 = vpop.xlane.xlu0 %880 }
 0x258   :  { %1965 = vrsqrt.f32 %v1145_v38  ;;  %v1132_v62 = vmax.f32 %v1121_v11, 0.0  ;;  %v2790_v32 = vmul.f32 0.0011534025, %v881_v39  ;;  %v2801_v39 = vld [vmem:[%s3373_s1] sm:$0xff] }
 0x259   :  { %v1146_v42 = vadd.f32 1e-05, %v1135_v18  ;;  %v1115_v24 = vmul.f32 %v2788_v61, %v2788_v61  ;;  %v1962_v55 = vpop.eup %1961 }
 0x25a   :  { %v1143_v37 = vadd.f32 1e-05, %v1132_v62  ;;  %v1054_v16 = vpop.xlane.xlu1 %1053  ;;  %v1114_v50 = vmul.f32 %v2790_v32, %v2790_v32 }
 0x25b   :  { %1967 = vrsqrt.f32 %v1146_v42  ;;  %v1104_v34 = vmul.f32 0.0011534025, %v1054_v16  ;;  %v1046_v27 = vpop.xlane.xlu0 %1045 }
 0x25c   :  { %1969 = vrsqrt.f32 %v1143_v37  ;;  %v1103_v41 = vmul.f32 0.0011534025, %v1046_v27 }
 0x25d   :  { %v1126_v60 = vsub.f32 %v1104_v34, %v1115_v24  ;;  %v2812_v34 = vld [vmem:[%s3373_s1 + $0x10] sm:$0xff] }
 0x25e   :  { %v1964_v54 = vpop.eup %1963  ;;  %v1125_v30 = vsub.f32 %v1103_v41, %v1114_v50  ;;  %v905_v38 = vpop.xlane.xlu1 %904  ;;  %v2815_v27 = vmul.f32 %v2812_v34, %v1962_v55 }
 0x25f   :  { %v1137_v11 = vmax.f32 %v1126_v60, 0.0  ;;  %v2796_v56 = vmul.f32 0.0011534025, %v905_v38  ;;  %v897_v18 = vpop.xlane.xlu0 %896  ;;  %v2804_v16 = vmul.f32 %v2801_v39, %v1964_v54 }
 0x260   :  { %v1136_v62 = vmax.f32 %v1125_v30, 0.0  ;;  %v2806_v42 = vmul.f32 0.0011534025, %v897_v18 }
 0x261   :  { %v1148_v37 = vadd.f32 1e-05, %v1137_v11  ;;  %v1175_v24 = vmul.f32 %v2804_v16, %v1087_v9  ;;  %v1117_v54 = vmul.f32 %v2796_v56, %v2796_v56 }
 0x262   :  { %v1966_v50 = vpop.eup %1965  ;;  %v1147_v41 = vadd.f32 1e-05, %v1136_v62  ;;  %v1070_v60 = vpop.xlane.xlu1 %1069  ;;  %v1116_v9 = vmul.f32 %v2806_v42, %v2806_v42  ;;  %v1177_v62 = vmul.f32 %v2815_v27, %v2772_v21  ;;  %v2841_v21 = vld [vmem:[%s3373_s1 + $0x8] sm:$0xff] }
 0x263   :  { %1971 = vrsqrt.f32 %v1148_v37  ;;  %v1106_v30 = vmul.f32 0.0011534025, %v1070_v60  ;;  %v1062_v38 = vpop.xlane.xlu0 %1061  ;;  %1197 = vrot.lane.b32.xlu1 %v1175_v24, %s2016_s15  ;;  %v2827_v37 = vld [vmem:[%s3373_s1 + $0x18] sm:$0xff] }
 0x264   :  { %1973 = vrsqrt.f32 %v1147_v41  ;;  %v1105_v11 = vmul.f32 0.0011534025, %v1062_v38  ;;  %v2830_v60 = vmul.f32 %v2827_v37, %v1966_v50  ;;  %v2835_v41 = vld [vmem:[%s3373_s1 + $0x20] sm:$0xff] }
 0x265   :  { %v1968_v18 = vpop.eup %1967  ;;  %v1128_v55 = vsub.f32 %v1106_v30, %v1117_v54 }
 0x266   :  { %v1970_v1 = vpop.eup %1969  ;;  %v1127_v24 = vsub.f32 %v1105_v11, %v1116_v9  ;;  %v921_v9 = vpop.xlane.xlu1 %920  ;;  %v1178_v58 = vmul.f32 %v2830_v60, %v2776_v22  ;;  %v2858_v22 = vld [vmem:[%s3373_s1 + $0x28] sm:$0xff] }
 0x267   :  { %v1139_v38 = vmax.f32 %v1128_v55, 0.0  ;;  %v913_v54 = vpop.xlane.xlu0 %912  ;;  %1201 = vrot.lane.b32.xlu1 %v1177_v62, %s2016_s15  ;;  %v1165_v30 = vmul.f32 %v2841_v21, %v1970_v1  ;;  %v1168_v55 = vmul.f32 %v1968_v18, %v2835_v41  ;;  %v2853_v1 = vld [vmem:[%s3373_s1 + $0x30] sm:$0xff] }
 0x268   :  { %v1138_v50 = vmax.f32 %v1127_v24, 0.0  ;;  %v1096_v57 = vmul.f32 0.0011534025, %v913_v54  ;;  %v1097_v24 = vmul.f32 0.0011534025, %v921_v9 }
 0x269   :  { %v1150_v63 = vadd.f32 1e-05, %v1139_v38  ;;  %v1176_v11 = vmul.f32 %v1165_v30, %v2782_v3  ;;  %v1179_v18 = vmul.f32 %v1168_v55, %v2778_v8  ;;  %v2871_v8 = vld [vmem:[%s3373_s1 + $0x40] sm:$0xff] }
 0x26a   :  { %v1149_v47 = vadd.f32 1e-05, %v1138_v50  ;;  %v1118_v3 = vmul.f32 %v1096_v57, %v1096_v57  ;;  %v1119_v9 = vmul.f32 %v1097_v24, %v1097_v24 }
 0x26b   :  { %1975 = vrsqrt.f32 %v1150_v63  ;;  %v1078_v62 = vpop.xlane.xlu0 %1077  ;;  %1199 = vrot.lane.b32.xlu0 %v1176_v11, %s2016_s15  ;;  %1203 = vrot.lane.b32.xlu1 %v1178_v58, %s2016_s15 }
 0x26c   :  { %1977 = vrsqrt.f32 %v1149_v47  ;;  %v1107_v38 = vmul.f32 0.0011534025, %v1078_v62 }
 0x26d   :  { %v1972_v63 = vpop.eup %1971 }
 0x26e   :  { %v1974_v54 = vpop.eup %1973  ;;  %v1129_v50 = vsub.f32 %v1107_v38, %v1118_v3  ;;  %v1170_v58 = vmul.f32 %v1972_v63, %v2853_v1  ;;  %v28_v38 = vld [vmem:[%s3373_s1 + $0x38] sm:$0xff] }
 0x26f   :  { %1205 = vrot.lane.b32.xlu0 %v1179_v18, %s2016_s15  ;;  %v1086_v11 = vpop.xlane.xlu0 %1085  ;;  %v1169_v47 = vmul.f32 %v1974_v54, %v2858_v22 }
 0x270   :  { %v1140_v25 = vmax.f32 %v1129_v50, 0.0  ;;  %v1108_v62 = vmul.f32 0.0011534025, %v1086_v11  ;;  %v1181_v53 = vmul.f32 %v1170_v58, %v2788_v61  ;;  %v31_v50 = vld [vmem:[%s3373_s1 + $0x50] sm:$0xff] }
 0x271   :  { %v1180_v0 = vmul.f32 %v1169_v47, %v2790_v32 }
 0x272   :  { %v1151_v35 = vadd.f32 1e-05, %v1140_v25  ;;  %v1130_v6 = vsub.f32 %v1108_v62, %v1119_v9 }
 0x273   :  { %1209 = vrot.lane.b32.xlu0 %v1181_v53, %s2016_s15  ;;  %1207 = vrot.lane.b32.xlu1 %v1180_v0, %s2016_s15 }
 0x274   :  { %1979 = vrsqrt.f32 %v1151_v35  ;;  %v1141_v3 = vmax.f32 %v1130_v6, 0.0  ;;  %v30_v35 = vld [vmem:[%s3373_s1 + $0x48] sm:$0xff] }
 0x275   :  { %v1976_v61 = vpop.eup %1975 }
 0x276   :  { %v1978_v63 = vpop.eup %1977  ;;  %v1152_v32 = vadd.f32 1e-05, %v1141_v3  ;;  %v1172_v25 = vmul.f32 %v1976_v61, %v2871_v8 }
 0x277   :  { %v1171_v18 = vmul.f32 %v1978_v63, %v28_v38 }
 0x278   :  { %1981 = vrsqrt.f32 %v1152_v32  ;;  %v1183_v0 = vmul.f32 %v1172_v25, %v2796_v56 }
 0x279   :  { %v1182_v53 = vmul.f32 %v1171_v18, %v2806_v42 }
 0x27a   :  { %1213 = vrot.lane.b32.xlu0 %v1183_v0, %s2016_s15 }
 0x27b   :  { %1211 = vrot.lane.b32.xlu1 %v1182_v53, %s2016_s15 }
 0x27e   :  { %v1980_v6 = vpop.eup %1979 }
 0x27f   :  { %v1173_v54 = vmul.f32 %v1980_v6, %v30_v35 }
 0x281   :  { %v1184_v11 = vmul.f32 %v1173_v54, %v1096_v57  ;;  %v2017_v57 = vmov 4  }
 0x282   :  { %v1982_v9 = vpop.eup %1981 }
 0x283   :  { %1215 = vrot.lane.b32.xlu1 %v1184_v11, %s2016_s15  ;;  %v1174_v56 = vmul.f32 %v1982_v9, %v31_v50 }
 0x285   :  { %v1185_v42 = vmul.f32 %v1174_v56, %v1097_v24 }
 0x287   :  { %1243 = vperm.xlu1 %1947, %v2804_v16   ;;  %1217 = vrot.lane.b32.xlu0 %v1185_v42, %s2016_s15 }
 0x28b   :  { %1258 = vperm.xlu1 %1947, %v2830_v60   ;;  %1248 = vperm.xlu0 %1948, %v1165_v30  }
 0x28f   :  { %1263 = vperm.xlu1 %1947, %v1168_v55   ;;  %1253 = vperm.xlu0 %1948, %v2815_v27   ;;  %v3480_v27 = vmov 3  }
 0x293   :  { %1278 = vperm.xlu1 %1947, %v1171_v18   ;;  %1268 = vperm.xlu0 %1948, %v1169_v47  }
 0x297   :  { %1283 = vperm.xlu1 %1947, %v1172_v25   ;;  %1273 = vperm.xlu0 %1948, %v1170_v58  }
 0x29b   :  { %1951 = vset.pattern.permute.xlu1 %v2017_v57  ;;  %1949 = vset.pattern.permute.xlu0 %v2017_v57 }
 0x2d5   :  { %v1198_v62 = vpop.permute.xlu1 %1197 }
 0x2d6   :  { %v1230_v24 = vsub.f32 %v2801_v39, %v1198_v62 }
 0x2d8   :  { %1375 = vperm.xlu1 %1951, %v1230_v24  }
 0x2d9   :  { %v1202_v16 = vpop.permute.xlu1 %1201 }
 0x2da   :  { %v1232_v3 = vsub.f32 %v2812_v34, %v1202_v16 }
 0x2dc   :  { %1385 = vperm.xlu0 %1949, %v1232_v3   ;;  %v3481_v3 = vld [vmem:[#allocation12_spill] sm:$0xff] }
 0x2dd   :  { %v1200_v60 = vpop.permute.xlu0 %1199  ;;  %v1204_v30 = vpop.permute.xlu1 %1203 }
 0x2de   :  { %v1233_v55 = vsub.f32 %v2827_v37, %v1204_v30  ;;  %v1231_v58 = vsub.f32 %v2841_v21, %v1200_v60  ;;  %v3482_v60 = vld [vmem:[#allocation7_spill] sm:$0xff] }
 0x2e0   :  { %1950 = vset.pattern.permute.xlu0 %v3480_v27  ;;  %1390 = vperm.xlu1 %1951, %v1233_v55  }
 0x2e1   :  { %v1206_v47 = vpop.permute.xlu0 %1205  ;;  %1288 = vperm.xlu0 %1950, %v1173_v54  }
 0x2e2   :  { %v1234_v39 = vsub.f32 %v2835_v41, %v1206_v47  ;;  %v3486_v47 = vld [vmem:[#allocation35_spill] sm:$0xff] }
 0x2e4   :  { %1380 = vperm.xlu1 %1951, %v1231_v58  }
 0x2e5   :  { %v1210_v61 = vpop.permute.xlu0 %1209  ;;  %1952 = vset.pattern.permute.xlu0 %v2017_v57  ;;  %v1208_v34 = vpop.permute.xlu1 %1207 }
 0x2e6   :  { %v1236_v63 = vsub.f32 %v2853_v1, %v1210_v61  ;;  %v1235_v32 = vsub.f32 %v2858_v22, %v1208_v34  ;;  %v3490_v61 = vld [vmem:[#allocation41_spill] sm:$0xff] }
 0x2e7   :  { %v3492_v34 = vld [vmem:[#allocation9_spill] sm:$0xff] }
 0x2e8   :  { %1405 = vperm.xlu0 %1952, %v1236_v63   ;;  %1395 = vperm.xlu1 %1951, %v1234_v39  }
 0x2ec   :  { %1953 = vset.pattern.permute.xlu0 %v3480_v27  ;;  %1400 = vperm.xlu1 %1951, %v1235_v32   ;;  %v1214_v18 = vpop.permute.xlu0 %1213 }
 0x2ed   :  { %1293 = vperm.xlu0 %1953, %v1174_v56   ;;  %v1212_v37 = vpop.permute.xlu1 %1211  ;;  %v1238_v21 = vsub.f32 %v2871_v8, %v1214_v18  ;;  %v3494_v18 = vld [vmem:[#allocation8_spill] sm:$0xff] }
 0x2ee   :  { %v1237_v25 = vsub.f32 %v28_v38, %v1212_v37  ;;  %v3493_v37 = vld [vmem:[#allocation16_spill] sm:$0xff] }
 0x2f0   :  { %1410 = vperm.xlu1 %1951, %v1237_v25  }
 0x2f1   :  { %1954 = vset.pattern.permute.xlu0 %v2017_v57 }
 0x2f4   :  { %1415 = vperm.xlu1 %1951, %v1238_v21  }
 0x2f5   :  { %v1216_v41 = vpop.permute.xlu1 %1215 }
 0x2f6   :  { %v1239_v0 = vsub.f32 %v30_v35, %v1216_v41  ;;  %v3495_v41 = vld [vmem:[#allocation14_spill] sm:$0xff] }
 0x2f8   :  { %1420 = vperm.xlu1 %1951, %v1239_v0  }
 0x2f9   :  { %v1218_v1 = vpop.permute.xlu0 %1217 }
 0x2fa   :  { %v1240_v53 = vsub.f32 %v31_v50, %v1218_v1  ;;  %v3496_v1 = vld [vmem:[#allocation17_spill] sm:$0xff] }
 0x2fc   :  { %1425 = vperm.xlu1 %1951, %v1240_v53  }
 0x306   :  { %v1244_v6 = vpop.permute.xlu1 %1243 }
 0x307   :  { %v2903_v56 = vmul.f32 %v1244_v6, %v2323_v7  ;;  %v2906_v38 = vmul.f32 %v1244_v6, %v2354_v4  ;;  %v2909_v8 = vmul.f32 %v1244_v6, %v2315_v48  ;;  %v2912_v35 = vmul.f32 %v1244_v6, %v2347_v23 }
 0x308   :  { %v2915_v50 = vmul.f32 %v1244_v6, %v2550_v46  ;;  %v2918_v42 = vmul.f32 %v1244_v6, %v2541_v40  ;;  %v2921_v57 = vmul.f32 %v1244_v6, %v2641_v20  ;;  %v3497_v6 = vld [vmem:[#allocation24_spill] sm:$0xff] }
 0x30a   :  { %v1249_v22 = vpop.permute.xlu0 %1248  ;;  %v1259_v54 = vpop.permute.xlu1 %1258 }
 0x30b   :  { %v2924_v7 = vmul.f32 %v1249_v22, %v2339_v19  ;;  %v2927_v4 = vmul.f32 %v1249_v22, %v2376_v44  ;;  %v2930_v48 = vmul.f32 %v1249_v22, %v2335_v13  ;;  %v2933_v23 = vmul.f32 %v1249_v22, %v2362_v12 }
 0x30c   :  { %v2936_v62 = vmul.f32 %v1259_v54, %v2378_v28  ;;  %v2939_v40 = vmul.f32 %v1259_v54, %v2424_v43  ;;  %v2942_v20 = vmul.f32 %v1259_v54, %v2368_v17  ;;  %v2945_v19 = vmul.f32 %v1259_v54, %v2410_v45 }
 0x30d   :  { %v2948_v13 = vmul.f32 %v1249_v22, %v2570_v26  ;;  %v2951_v12 = vmul.f32 %v1249_v22, %v2560_v14  ;;  %v2954_v24 = vmul.f32 %v1249_v22, %v2659_v51  ;;  %v2957_v28 = vmul.f32 %v1259_v54, %v2621_v36 }
 0x30e   :  { %v1254_v11 = vpop.permute.xlu0 %1253  ;;  %v1264_v9 = vpop.permute.xlu1 %1263  ;;  %v2962_v45 = vmul.f32 %v1259_v54, %v2611_v2  ;;  %v2965_v16 = vmul.f32 %v2650_v10, %v1259_v54  ;;  %v3484_v2 = vld [vmem:[#allocation33_spill] sm:$0xff]  ;;  %v3485_v10 = vld [vmem:[#allocation31_spill] sm:$0xff] }
 0x30f   :  { %v1311_v43 = vmul.f32 %v1254_v11, %v2358_v5  ;;  %v1313_v17 = vmul.f32 %v1254_v11, %v2402_v33  ;;  %v1310_v26 = vmul.f32 %v1254_v11, %v2349_v59  ;;  %v1312_v14 = vmul.f32 %v1254_v11, %v2395_v15  ;;  %v3483_v33 = vld [vmem:[#allocation10_spill] sm:$0xff]  ;;  %v3498_v54 = vld [vmem:[#allocation15_spill] sm:$0xff] }
 0x310   :  { %v2970_v51 = vmul.f32 %v1264_v9, %v2406_v31  ;;  %v2973_v36 = vmul.f32 %v1264_v9, %v3481_v3  ;;  %v2976_v5 = vmul.f32 %v1264_v9, %v3482_v60  ;;  %v2979_v30 = vmul.f32 %v1264_v9, %v3483_v33  ;;  %v3488_v31 = vld [vmem:[#allocation34_spill] sm:$0xff]  ;;  %v3500_v60 = vld [vmem:[#allocation37_spill] sm:$0xff] }
 0x311   :  { %v1315_v55 = vmul.f32 %v1254_v11, %v3484_v2  ;;  %v1314_v27 = vmul.f32 %v1254_v11, %v3485_v10  ;;  %v1316_v59 = vmul.f32 %v3486_v47, %v1254_v11  ;;  %v2985_v15 = vmul.f32 %v1264_v9, %v2639_v49  ;;  %v3502_v2 = vld [vmem:[#allocation36_spill] sm:$0xff] }
 0x312   :  { %v1269_v46 = vpop.permute.xlu0 %1268  ;;  %v1279_v44 = vpop.permute.xlu1 %1278  ;;  %v2988_v58 = vmul.f32 %v1264_v9, %v3488_v31  ;;  %v2991_v39 = vmul.f32 %v1264_v9, %v3490_v61  ;;  %v3499_v9 = vld [vmem:[#allocation22_spill] sm:$0xff]  ;;  %v3506_v61 = vld [vmem:[#allocation13_spill] sm:$0xff] }
 0x313   :  { %3487 = vst [vmem:[#allocation12_spill] sm:$0xff] %v2985_v15  ;;  %v2994_v32 = vmul.f32 %v1269_v46, %v3492_v34  ;;  %v2997_v25 = vmul.f32 %v1269_v46, %v3493_v37  ;;  %v3000_v21 = vmul.f32 %v1269_v46, %v3494_v18  ;;  %v3003_v0 = vmul.f32 %v1269_v46, %v3495_v41  ;;  %v3507_v37 = vld [vmem:[#allocation20_spill] sm:$0xff]  ;;  %v3508_v41 = vld [vmem:[#allocation42_spill] sm:$0xff] }
 0x314   :  { %3489 = vst [vmem:[#allocation7_spill] sm:$0xff] %v2988_v58  ;;  %3491 = vst [vmem:[#allocation10_spill] sm:$0xff] %v2991_v39  ;;  %v3006_v53 = vmul.f32 %v1279_v44, %v3496_v1  ;;  %v3009_v22 = vmul.f32 %v1279_v44, %v3497_v6  ;;  %v3012_v11 = vmul.f32 %v1279_v44, %v3498_v54  ;;  %v3510_v6 = vld [vmem:[#allocation43_spill] sm:$0xff] }
 0x315   :  { %v3015_v3 = vmul.f32 %v1279_v44, %v3499_v9  ;;  %v3018_v33 = vmul.f32 %v1269_v46, %v3500_v60  ;;  %v3021_v10 = vmul.f32 %v1269_v46, %v3502_v2  ;;  %v3024_v47 = vmul.f32 %v1269_v46, %v2702_v52  ;;  %v3512_v9 = vld [vmem:[#allocation11_spill] sm:$0xff]  ;;  %v3513_v52 = vld [vmem:[#allocation18_spill] sm:$0xff] }
 0x316   :  { %v1274_v63 = vpop.permute.xlu0 %1273  ;;  %v1284_v49 = vpop.permute.xlu1 %1283  ;;  %v3027_v31 = vmul.f32 %v1279_v44, %v2704_v29  ;;  %v3036_v1 = vmul.f32 %v1279_v44, %v3508_v41  ;;  %v3039_v54 = vmul.f32 %v3510_v6, %v1279_v44  ;;  %v3514_v29 = vld [vmem:[#allocation21_spill] sm:$0xff]  ;;  %v3517_v41 = vld [vmem:[#allocation26_spill] sm:$0xff]  ;;  %v3518_v44 = vld [vmem:[#allocation40_spill] sm:$0xff] }
 0x317   :  { %3501 = vst [vmem:[#allocation33_spill] sm:$0xff] %v3018_v33  ;;  %3503 = vst [vmem:[#allocation31_spill] sm:$0xff] %v3021_v10  ;;  %v3030_v34 = vmul.f32 %v1274_v63, %v3506_v61  ;;  %v3033_v18 = vmul.f32 %v1274_v63, %v3507_v37  ;;  %v3042_v60 = vmul.f32 %v1274_v63, %v3512_v9  ;;  %v3515_v61 = vld [vmem:[#allocation27_spill] sm:$0xff]  ;;  %v3526_v10 = vld [vmem:[#allocation44_spill] sm:$0xff] }
 0x318   :  { %3504 = vst [vmem:[#allocation35_spill] sm:$0xff] %v3024_v47  ;;  %3505 = vst [vmem:[#allocation34_spill] sm:$0xff] %v3027_v31  ;;  %v3045_v46 = vmul.f32 %v1274_v63, %v3513_v52  ;;  %v3048_v2 = vmul.f32 %v1284_v49, %v3514_v29  ;;  %v3051_v31 = vmul.f32 %v1284_v49, %v3515_v61  ;;  %v3516_v47 = vld [vmem:[#allocation19_spill] sm:$0xff] }
 0x319   :  { %3509 = vst [vmem:[#allocation41_spill] sm:$0xff] %v3036_v1  ;;  %3511 = vst [vmem:[#allocation9_spill] sm:$0xff] %v3039_v54  ;;  %v3054_v39 = vmul.f32 %v1284_v49, %v3516_v47  ;;  %v3057_v1 = vmul.f32 %v1284_v49, %v3517_v41  ;;  %v3060_v6 = vmul.f32 %v1274_v63, %v3518_v44  ;;  %v3520_v9 = vld [vmem:[#allocation39_spill] sm:$0xff] }
 0x31a   :  { %v3063_v54 = vmul.f32 %v1274_v63, %v3520_v9  ;;  %v3522_v9 = vld [vmem:[#allocation38_spill] sm:$0xff]  ;;  %v3528_v58 = vld [vmem:[#allocation47_spill] sm:$0xff] }
 0x31b   :  { %3519 = vst [vmem:[#allocation16_spill] sm:$0xff] %v3060_v6 }
 0x31c   :  { %3521 = vst [vmem:[#allocation8_spill] sm:$0xff] %v3063_v54  ;;  %v3084_v54 = vmul.f32 %v3522_v9, %v1274_v63 }
 0x31e   :  { %3523 = vst [vmem:[#allocation14_spill] sm:$0xff] %v3084_v54 }
 0x357   :  { %v1376_v37 = vpop.permute.xlu1 %1375 }
 0x358   :  { %v3066_v52 = vadd.f32 %v1376_v37, %v2903_v56  ;;  %v3069_v29 = vadd.f32 %v1376_v37, %v2906_v38  ;;  %v3072_v61 = vadd.f32 %v1376_v37, %v2909_v8  ;;  %v3075_v47 = vadd.f32 %v1376_v37, %v2912_v35  ;;  %v3524_v56 = vld [vmem:[#allocation46_spill] sm:$0xff] }
 0x359   :  { %v3078_v41 = vadd.f32 %v1376_v37, %v2915_v50  ;;  %v3081_v44 = vadd.f32 %v1376_v37, %v2918_v42  ;;  %v3087_v6 = vmul.f32 %v1284_v49, %v3524_v56  ;;  %v3091_v8 = vadd.f32 %v1376_v37, %v2921_v57 }
 0x35a   :  { %v1506_v38 = vmax.f32 %v3066_v52, 0.0  ;;  %v3094_v35 = vmul.f32 %v1284_v49, %v3526_v10  ;;  %v3097_v50 = vmul.f32 %v1284_v49, %v3528_v58  ;;  %v1508_v42 = vmax.f32 %v3069_v29, 0.0 }
 0x35b   :  { %3525 = vst [vmem:[#allocation17_spill] sm:$0xff] %v3087_v6  ;;  %v1386_v33 = vpop.permute.xlu0 %1385  ;;  %v1505_v63 = vmax.f32 %v3072_v61, 0.0  ;;  %v1507_v9 = vmax.f32 %v3075_v47, 0.0 }
 0x35c   :  { %3527 = vst [vmem:[#allocation24_spill] sm:$0xff] %v3094_v35  ;;  %3529 = vst [vmem:[#allocation15_spill] sm:$0xff] %v3097_v50  ;;  %v1443_v6 = vadd.f32 %v1386_v33, %v1311_v43  ;;  %v1445_v52 = vadd.f32 %v1386_v33, %v1313_v17  ;;  %v1442_v54 = vadd.f32 %v1386_v33, %v1310_v26  ;;  %v3534_v17 = vld [vmem:[#allocation23_spill] sm:$0xff]  ;;  %v3536_v43 = vld [vmem:[#allocation28_spill] sm:$0xff] }
 0x35d   :  { %v1444_v57 = vadd.f32 %v1386_v33, %v1312_v14  ;;  %v3104_v10 = vadd.f32 %v1386_v33, %v1315_v55  ;;  %v3106_v35 = vadd.f32 %v1386_v33, %v1314_v27  ;;  %v3108_v58 = vadd.f32 %v1386_v33, %v1316_v59 }
 0x35e   :  { %v1520_v49 = vmax.f32 %v1443_v6, 0.0  ;;  %v1522_v29 = vmax.f32 %v1445_v52, 0.0  ;;  %v1519_v50 = vmax.f32 %v1442_v54, 0.0  ;;  %v3532_v54 = vld [vmem:[#allocation25_spill] sm:$0xff] }
 0x35f   :  { %3530 = vst [vmem:[#allocation22_spill] sm:$0xff] %v3106_v35  ;;  %3531 = vst [vmem:[#allocation37_spill] sm:$0xff] %v3108_v58  ;;  %v1391_v47 = vpop.permute.xlu1 %1390  ;;  %v1521_v15 = vmax.f32 %v1444_v57, 0.0  ;;  %v3533_v52 = vld [vmem:[#allocation29_spill] sm:$0xff] }
 0x360   :  { %v3114_v14 = vpop.permute.xlu0 %1288  ;;  %v1450_v55 = vadd.f32 %v1391_v47, %v2936_v62  ;;  %v1452_v27 = vadd.f32 %v1391_v47, %v2939_v40  ;;  %v1449_v59 = vadd.f32 %v1391_v47, %v2942_v20  ;;  %v1451_v33 = vadd.f32 %v1391_v47, %v2945_v19 }
 0x361   :  { %v3122_v6 = vmul.f32 %v3114_v14, %v3532_v54  ;;  %v3126_v57 = vmul.f32 %v3114_v14, %v3533_v52  ;;  %v3130_v26 = vmul.f32 %v3114_v14, %v3534_v17  ;;  %v3134_v62 = vmul.f32 %v3114_v14, %v3536_v43  ;;  %v3539_v17 = vld [vmem:[#allocation49_spill] sm:$0xff] }
 0x362   :  { %v1527_v40 = vmax.f32 %v1450_v55, 0.0  ;;  %v1529_v20 = vmax.f32 %v1452_v27, 0.0  ;;  %v1526_v61 = vmax.f32 %v1449_v59, 0.0  ;;  %v1528_v19 = vmax.f32 %v1451_v33, 0.0 }
 0x363   :  { %3535 = vst [vmem:[#allocation36_spill] sm:$0xff] %v3130_v26  ;;  %3537 = vst [vmem:[#allocation13_spill] sm:$0xff] %v3134_v62  ;;  %v1381_v37 = vpop.permute.xlu1 %1380  ;;  %v3137_v54 = vadd.f32 %v1391_v47, %v2957_v28  ;;  %v3140_v56 = vadd.f32 %v1391_v47, %v2962_v45  ;;  %v3143_v52 = vadd.f32 %v1391_v47, %v2965_v16 }
 0x364   :  { %v3147_v58 = vmul.f32 %v3114_v14, %v3539_v17  ;;  %v1436_v43 = vadd.f32 %v1381_v37, %v2924_v7  ;;  %v1438_v55 = vadd.f32 %v1381_v37, %v2927_v4  ;;  %v1435_v27 = vadd.f32 %v1381_v37, %v2930_v48 }
 0x365   :  { %3538 = vst [vmem:[#allocation20_spill] sm:$0xff] %v3143_v52  ;;  %v1437_v59 = vadd.f32 %v1381_v37, %v2933_v23  ;;  %v1591_v28 = vpack.c.bf16 %v1527_v40, %v1520_v49  ;;  %v1593_v33 = vpack.c.bf16 %v1529_v20, %v1522_v29  ;;  %v1590_v35 = vpack.c.bf16 %v1526_v61, %v1519_v50 }
 0x366   :  { %v1592_v45 = vpack.c.bf16 %v1528_v19, %v1521_v15  ;;  %v1513_v62 = vmax.f32 %v1436_v43, 0.0  ;;  %v1515_v26 = vmax.f32 %v1438_v55, 0.0  ;;  %v1512_v16 = vmax.f32 %v1435_v27, 0.0 }
 0x367   :  { %v1514_v47 = vmax.f32 %v1437_v59, 0.0  ;;  %v3153_v52 = vpop.permute.xlu0 %1405  ;;  %v3155_v17 = vpop.permute.xlu1 %1395  ;;  %v1440_v7 = vadd.f32 %v1381_v37, %v2948_v13  ;;  %v3159_v4 = vadd.f32 %v1381_v37, %v2951_v12  ;;  %v3162_v48 = vadd.f32 %v1381_v37, %v2954_v24 }
 0x368   :  { %v1531_v23 = vmax.f32 %v3137_v54, 0.0  ;;  %v1584_v50 = vpack.c.bf16 %v1513_v62, %v1506_v38  ;;  %v1586_v15 = vpack.c.bf16 %v1515_v26, %v1508_v42  ;;  %v1583_v49 = vpack.c.bf16 %v1512_v16, %v1505_v63  ;;  %v3541_v16 = vld [vmem:[#allocation32_spill] sm:$0xff] }
 0x369   :  { %v1585_v29 = vpack.c.bf16 %v1514_v47, %v1507_v9  ;;  %v1457_v61 = vadd.f32 %v3155_v17, %v2970_v51  ;;  %v1459_v40 = vadd.f32 %v3155_v17, %v2973_v36  ;;  %v1456_v13 = vadd.f32 %v3155_v17, %v2976_v5  ;;  %v3542_v47 = vld [vmem:[#allocation5_spill] sm:$0xff] }
 0x36a   :  { %v1458_v12 = vadd.f32 %v3155_v17, %v2979_v30  ;;  %1651 = vmatprep.subr.bf16.mxu1 %v1584_v50  ;;  %1692 = vmatprep.subr.bf16.mxu0 %v1586_v15  ;;  %v1471_v24 = vadd.f32 %v3153_v52, %v3030_v34  ;;  %v1473_v38 = vadd.f32 %v3153_v52, %v3033_v18  ;;  %v1517_v42 = vmax.f32 %v1440_v7, 0.0 }
 0x36b   :  { %v1470_v51 = vadd.f32 %v3153_v52, %v3042_v60  ;;  %1652 = vmatpush1.bf16.msra.mxu1 %v1583_v49  ;;  %1693 = vmatpush1.bf16.msra.mxu0 %v1585_v29  ;;  %v3179_v36 = vpop.permute.xlu1 %1400  ;;  %v1534_v5 = vmax.f32 %v1457_v61, 0.0  ;;  %v1536_v63 = vmax.f32 %v1459_v40, 0.0  ;;  %v1533_v9 = vmax.f32 %v1456_v13, 0.0  ;;  %v3543_v13 = vld [vmem:[#allocation30_spill] sm:$0xff] }
 0x36c   :  { %v1535_v30 = vmax.f32 %v1458_v12, 0.0  ;;  %v3181_v37 = vpop.permute.xlu0 %1293  ;;  %1653 = vmatprep.subr.bf16.mxu1 %v1591_v28  ;;  %1694 = vmatprep.subr.bf16.mxu0 %v1593_v33  ;;  %v1464_v34 = vadd.f32 %v3179_v36, %v2994_v32  ;;  %v1466_v18 = vadd.f32 %v3179_v36, %v2997_v25  ;;  %v1463_v60 = vadd.f32 %v3179_v36, %v3000_v21  ;;  %v3540_v28 = vld [vmem:[#allocation6_spill] sm:$0xff] }
 0x36d   :  { %v1548_v26 = vmax.f32 %v1471_v24, 0.0  ;;  %v1465_v62 = vadd.f32 %v3179_v36, %v3003_v0  ;;  %v1550_v20 = vmax.f32 %v1473_v38, 0.0  ;;  %v1547_v19 = vmax.f32 %v1470_v51, 0.0 }
 0x36e   :  { %v1472_v43 = vadd.f32 %v3153_v52, %v3045_v46  ;;  %v1541_v55 = vmax.f32 %v1464_v34, 0.0  ;;  %v1543_v27 = vmax.f32 %v1466_v18, 0.0  ;;  %v1540_v59 = vmax.f32 %v1463_v60, 0.0 }
 0x36f   :  { %v3195_v32 = vmul.f32 %v3181_v37, %v3540_v28  ;;  %1654 = vmatpush1.bf16.msra.mxu1 %v1590_v35  ;;  %1695 = vmatpush1.bf16.msra.mxu0 %v1592_v45  ;;  %v3197_v25 = vpop.permute.xlu1 %1410  ;;  %v1542_v21 = vmax.f32 %v1465_v62, 0.0  ;;  %v3201_v0 = vmul.f32 %v3181_v37, %v3541_v16  ;;  %v3205_v46 = vmul.f32 %v3181_v37, %v3542_v47  ;;  %v3549_v28 = vld [vmem:[#allocation13_spill] sm:$0xff]  ;;  %v3553_v16 = vld [vmem:[#allocation12_spill] sm:$0xff] }
 0x370   :  { %v1549_v33 = vmax.f32 %v1472_v43, 0.0  ;;  %v1598_v7 = vpack.c.bf16 %v1541_v55, %v1534_v5  ;;  %v1600_v50 = vpack.c.bf16 %v1543_v27, %v1536_v63  ;;  %v1597_v15 = vpack.c.bf16 %v1540_v59, %v1533_v9  ;;  %v3548_v59 = vld [vmem:[#allocation36_spill] sm:$0xff] }
 0x371   :  { %v1478_v49 = vadd.f32 %v3197_v25, %v3006_v53  ;;  %v1599_v35 = vpack.c.bf16 %v1542_v21, %v1535_v30  ;;  %v1480_v45 = vadd.f32 %v3197_v25, %v3009_v22  ;;  %v1477_v29 = vadd.f32 %v3197_v25, %v3012_v11 }
 0x372   :  { %v1479_v61 = vadd.f32 %v3197_v25, %v3015_v3  ;;  %1655 = vmatprep.subr.bf16.mxu1 %v1598_v7  ;;  %1696 = vmatprep.subr.bf16.mxu0 %v1600_v50  ;;  %v1368_v12 = vmul.f32 %v3181_v37, %v3543_v13  ;;  %v3544_v24 = vmax.f32 %v3078_v41, 0.0  ;;  %v1516_v53 = vmax.f32 %v3159_v4, 0.0 }
 0x373   :  { %v1555_v40 = vmax.f32 %v1478_v49, 0.0  ;;  %1656 = vmatpush1.bf16.msra.mxu1 %v1597_v15  ;;  %1697 = vmatpush1.bf16.msra.mxu0 %v1599_v35  ;;  %v3222_v22 = vpop.permute.xlu1 %1415  ;;  %v1557_v11 = vmax.f32 %v1480_v45, 0.0  ;;  %v1554_v51 = vmax.f32 %v1477_v29, 0.0  ;;  %v1518_v3 = vmax.f32 %v3162_v48, 0.0  ;;  %v3555_v45 = vld [vmem:[#allocation37_spill] sm:$0xff] }
 0x374   :  { %v3219_v38 = vpack.c.bf16 %v1517_v42, %v3544_v24  ;;  %v1556_v5 = vmax.f32 %v1479_v61, 0.0  ;;  %v1485_v9 = vadd.f32 %v3222_v22, %v3048_v2  ;;  %v1487_v41 = vadd.f32 %v3222_v22, %v3051_v31  ;;  %v3557_v24 = vld [vmem:[#allocation7_spill] sm:$0xff] }
 0x375   :  { %v1605_v63 = vpack.c.bf16 %v1555_v40, %v1548_v26  ;;  %v1484_v42 = vadd.f32 %v3222_v22, %v3054_v39  ;;  %v1607_v4 = vpack.c.bf16 %v1557_v11, %v1550_v20  ;;  %v1604_v30 = vpack.c.bf16 %v1554_v51, %v1547_v19 }
 0x376   :  { %v1606_v34 = vpack.c.bf16 %v1556_v5, %v1549_v33  ;;  %v1486_v18 = vadd.f32 %v3222_v22, %v3057_v1  ;;  %v1562_v60 = vmax.f32 %v1485_v9, 0.0  ;;  %v1564_v62 = vmax.f32 %v1487_v41, 0.0  ;;  %v3552_v33 = vld [vmem:[#allocation20_spill] sm:$0xff] }
 0x377   :  { %1657 = vmatprep.subr.bf16.mxu1 %v1605_v63  ;;  %v1561_v48 = vmax.f32 %v1484_v42, 0.0  ;;  %v3545_v26 = vmax.f32 %v3081_v44, 0.0  ;;  %1698 = vmatprep.subr.bf16.mxu0 %v1607_v4  ;;  %v3237_v31 = vpop.permute.xlu1 %1420  ;;  %v3546_v39 = vmax.f32 %v3091_v8, 0.0  ;;  %v3547_v19 = vmax.f32 %v3104_v10, 0.0  ;;  %v3550_v10 = vld [vmem:[#allocation22_spill] sm:$0xff] }
 0x378   :  { %1658 = vmatpush1.bf16.msra.mxu1 %v1604_v30  ;;  %v1563_v2 = vmax.f32 %v1486_v18, 0.0  ;;  %v1530_v55 = vmax.f32 %v3140_v56, 0.0  ;;  %1699 = vmatpush1.bf16.msra.mxu0 %v1606_v34  ;;  %v1492_v44 = vadd.f32 %v3237_v31, %v3122_v6  ;;  %v1494_v27 = vadd.f32 %v3237_v31, %v3126_v57  ;;  %v3554_v6 = vld [vmem:[#allocation33_spill] sm:$0xff]  ;;  %v3558_v30 = vld [vmem:[#allocation31_spill] sm:$0xff] }
 0x379   :  { %v3235_v43 = vpack.c.bf16 %v1516_v53, %v3545_v26  ;;  %v3241_v20 = vpack.c.bf16 %v1518_v3, %v3546_v39  ;;  %v3247_v1 = vpack.c.bf16 %v1531_v23, %v3547_v19  ;;  %v1491_v8 = vadd.f32 %v3237_v31, %v3548_v59  ;;  %v3561_v19 = vld [vmem:[#allocation16_spill] sm:$0xff] }
 0x37a   :  { %v1493_v21 = vadd.f32 %v3237_v31, %v3549_v28  ;;  %v3551_v54 = vmax.f32 %v3550_v10, 0.0  ;;  %v1532_v56 = vmax.f32 %v3552_v33, 0.0  ;;  %v1461_v47 = vadd.f32 %v3155_v17, %v3553_v16 }
 0x37b   :  { %v1468_v7 = vadd.f32 %v3179_v36, %v3554_v6  ;;  %v1569_v57 = vmax.f32 %v1492_v44, 0.0  ;;  %v1571_v50 = vmax.f32 %v1494_v27, 0.0  ;;  %v1568_v15 = vmax.f32 %v1491_v8, 0.0  ;;  %v3267_v35 = vpop.permute.xlu1 %1425 }
 0x37c   :  { %v3260_v23 = vpack.c.bf16 %v1530_v55, %v3551_v54  ;;  %v1570_v49 = vmax.f32 %v1493_v21, 0.0  ;;  %v3556_v29 = vmax.f32 %v3555_v45, 0.0  ;;  %v1538_v40 = vmax.f32 %v1461_v47, 0.0  ;;  %v3562_v21 = vld [vmem:[#allocation34_spill] sm:$0xff]  ;;  %v3564_v47 = vld [vmem:[#allocation41_spill] sm:$0xff] }
 0x37d   :  { %v1545_v13 = vmax.f32 %v1468_v7, 0.0  ;;  %v1460_v53 = vadd.f32 %v3155_v17, %v3557_v24  ;;  %v1612_v11 = vpack.c.bf16 %v1569_v57, %v1562_v60  ;;  %v1614_v51 = vpack.c.bf16 %v1571_v50, %v1564_v62  ;;  %v3559_v60 = vld [vmem:[#allocation10_spill] sm:$0xff]  ;;  %v3566_v45 = vld [vmem:[#allocation9_spill] sm:$0xff] }
 0x37e   :  { %v3271_v61 = vpack.c.bf16 %v1532_v56, %v3556_v29  ;;  %v1611_v5 = vpack.c.bf16 %v1568_v15, %v1561_v48  ;;  %v1613_v3 = vpack.c.bf16 %v1570_v49, %v1563_v2  ;;  %v1499_v63 = vadd.f32 %v3267_v35, %v3195_v32  ;;  %v3560_v2 = vld [vmem:[#allocation35_spill] sm:$0xff]  ;;  %v3563_v56 = vld [vmem:[#allocation8_spill] sm:$0xff]  ;;  %v3305_v7 = vld [vmem:[%s3375_s3] sm:$0xf]  ;;  %s2019_s3 = smov [#allocation2]  }
 0x37f   :  { %v1501_v9 = vadd.f32 %v3267_v35, %v3201_v0  ;;  %v1498_v41 = vadd.f32 %v3267_v35, %v3205_v46  ;;  %v1500_v42 = vadd.f32 %v3267_v35, %v1368_v12  ;;  %1659 = vmatprep.subr.bf16.mxu1 %v1612_v11  ;;  %1700 = vmatprep.subr.bf16.mxu0 %v1614_v51  ;;  %v1537_v18 = vmax.f32 %v1460_v53, 0.0  ;;  %v3565_v15 = vld [vmem:[#allocation14_spill] sm:$0xff]  ;;  %v3568_v53 = vld [vmem:[#allocation17_spill] sm:$0xff]  ;;  %s1834_s8 = sshll.u32 %s2019_s3, 4  ;;  %s1835_s8 = int_to_ptr.vmem [resolvable:$true] %s1834_s8 }
 0x380   :  { %v3282_v4 = vpack.c.bf16 %v1545_v13, %v1538_v40  ;;  %v1467_v34 = vadd.f32 %v3179_v36, %v3558_v30  ;;  %v1462_v62 = vadd.f32 %v3155_v17, %v3559_v60  ;;  %1660 = vmatpush1.bf16.msra.mxu1 %v1611_v5  ;;  %1701 = vmatpush1.bf16.msra.mxu0 %v1613_v3  ;;  %v1576_v32 = vmax.f32 %v1499_v63, 0.0  ;;  %s1987_s9 = scalar_lea.vmem %s1835_s8, 896  ;;  %p1992_p1 = scmp.lt.s32.totalorder %s1835_s8, %s1835_s8 }
 0x381   :  { %v1578_v0 = vmax.f32 %v1501_v9, 0.0  ;;  %v1575_v48 = vmax.f32 %v1498_v41, 0.0  ;;  %v1577_v26 = vmax.f32 %v1500_v42, 0.0  ;;  %v1469_v12 = vadd.f32 %v3179_v36, %v3560_v2  ;;  %v3569_v9 = vld [vmem:[#allocation48_spill] sm:$0xff]  ;;  %p1988_p0 = scmp.ne.s32.totalorder %s1835_s8, %s1987_s9  ;;  %p1993_p2 = scmp.lt.s32.totalorder %s1987_s9, %s1987_s9 }
 0x382   :  { %v1544_v46 = vmax.f32 %v1467_v34, 0.0  ;;  %v1539_v39 = vmax.f32 %v1462_v62, 0.0  ;;  %v1475_v55 = vadd.f32 %v3153_v52, %v3561_v19  ;;  %v1619_v44 = vpack.c.bf16 %v1576_v32, %v1576_v32  ;;  %v3570_v42 = vld [vmem:[#allocation24_spill] sm:$0xff]  ;;  %v3572_v32 = vld [vmem:[#allocation15_spill] sm:$0xff] }
 0x383   :  { %v1621_v27 = vpack.c.bf16 %v1578_v0, %v1578_v0  ;;  %v1618_v59 = vpack.c.bf16 %v1575_v48, %v1575_v48  ;;  %v1620_v8 = vpack.c.bf16 %v1577_v26, %v1577_v26  ;;  %v1546_v17 = vmax.f32 %v1469_v12, 0.0  ;;  %p1994_p3 = por %p1993_p2, %p1992_p1 }
 0x384   :  { %v1601_v28 = vpack.c.bf16 %v1544_v46, %v1537_v18  ;;  %v1482_v10 = vadd.f32 %v3197_v25, %v3562_v21  ;;  %v1552_v54 = vmax.f32 %v1475_v55, 0.0  ;;  %1873 = vmatprep.subr.msk.bf16.mxu1 %vm1629_vm2, %v1619_v44  ;;  %v1474_v16 = vadd.f32 %v3153_v52, %v3563_v56  ;;  %v3571_v18 = vld [vmem:[#allocation50_spill] sm:$0xff] }
 0x385   :  { %1875 = vmatprep.subr.msk.bf16.mxu0 %vm1629_vm2, %v1621_v27  ;;  %v1631_v36 = vsel %vm1629_vm2, %v1618_v59, 0  ;;  %v1637_v33 = vsel %vm1629_vm2, %v1620_v8, 0  ;;  %v1481_v6 = vadd.f32 %v3197_v25, %v3564_v47  ;;  %v1603_v57 = vpack.c.bf16 %v1546_v17, %v1539_v39  ;;  %v3576_v39 = vld [vmem:[#allocation45_spill] sm:$0xff]  ;;  %p1995_p4 = pnand %p1994_p3, %p1988_p0 }
 0x386   :  { %1662 = vmatpush1.bf16.msra.mxu1 %v1631_v36  ;;  %1703 = vmatpush1.bf16.msra.mxu0 %v1637_v33  ;;  %v1559_v50 = vmax.f32 %v1482_v10, 0.0  ;;  %v1476_v49 = vadd.f32 %v3153_v52, %v3565_v15  ;;  %v1483_v29 = vadd.f32 %v3197_v25, %v3566_v45  ;;  %v3567_v40 = vmov 0.0  }
 0x387   :  { %1733 = vmatprep.subr.bf16.mxu1 %v3219_v38  ;;  %1911 = vmatprep.subr.bf16.mxu0 %v3567_v40  ;;  %v1551_v13 = vmax.f32 %v1474_v16, 0.0  ;;  %v1558_v24 = vmax.f32 %v1481_v6, 0.0  ;;  %v1489_v11 = vadd.f32 %v3222_v22, %v3568_v53  ;;  %v1496_v51 = vadd.f32 %v3237_v31, %v3147_v58 }
 0x388   :  { %v1609_v5 = vpack.c.bf16 %v1559_v50, %v1552_v54  ;;  %v1553_v3 = vmax.f32 %v1476_v49, 0.0  ;;  %v1560_v63 = vmax.f32 %v1483_v29, 0.0  ;;  %v1363_v52 = vmul.f32 %v3114_v14, %v3569_v9 }
 0x389   :  { %1874 = vmatmul.mubr.msk.bf16.vlgmr.msra.gmra.mrb[40].mxu1 %vm1625_vm3, %v3305_v7  ;;  %1876 = vmatmul.mubr.msk.bf16.vlgmr.msra.gmra.mrb[44].mxu0 %vm1625_vm3, %v3305_v7  ;;  %v1608_v25 = vpack.c.bf16 %v1558_v24, %v1551_v13  ;;  %v1566_v38 = vmax.f32 %v1489_v11, 0.0  ;;  %v1573_v41 = vmax.f32 %v1496_v51, 0.0  ;;  %v1488_v30 = vadd.f32 %v3222_v22, %v3570_v42 }
 0x38a   :  { %1734 = vmatpush1.bf16.msra.mxu1 %v3235_v43  ;;  %1912 = vmatpush3.bf16.msra.mxu0 %v3241_v20  ;;  %v1610_v58 = vpack.c.bf16 %v1560_v63, %v1553_v3  ;;  %v1495_v34 = vadd.f32 %v3237_v31, %v1363_v52  ;;  %v1365_v60 = vmul.f32 %v3114_v14, %v3571_v18  ;;  %v3573_v46 = vmov 0  }
 0x38b   :  { %1735 = vmatprep.subr.bf16.mxu1 %v3247_v1  ;;  %1913 = vmatprep.subr.bf16.mxu0 %v3567_v40  ;;  %v1616_v62 = vpack.c.bf16 %v1573_v41, %v1566_v38  ;;  %v1490_v0 = vadd.f32 %v3222_v22, %v3572_v32  ;;  %v1565_v48 = vmax.f32 %v1488_v30, 0.0  ;;  %v3574_v22 = vld [vmem:[#allocation52_spill] sm:$0xff]  ;;  %v1372_v19 = vmul.f32 %v3576_v39, %v3181_v37 }
 0x38c   :  { %v1572_v26 = vmax.f32 %v1495_v34, 0.0  ;;  %v1497_v43 = vadd.f32 %v3237_v31, %v1365_v60  ;;  %1765 = vmatprep.mubr.bf16.mxu1 %v3573_v46  ;;  %1923 = vmatprep.mubr.msk.bf16.mxu0 %vm2018_vm4, %v3567_v40  ;;  %v1371_v2 = vmul.f32 %v3181_v37, %v3574_v22  ;;  %v3575_v31 = vld [vmem:[#allocation51_spill] sm:$0xff] }
 0x38d   :  { %v1567_v20 = vmax.f32 %v1490_v0, 0.0  ;;  %v1370_v12 = vmul.f32 %v3181_v37, %v3575_v31  ;;  %v1504_v44 = vadd.f32 %v3267_v35, %v1372_v19 }
 0x38e   :  { %1736 = vmatpush1.bf16.msra.mxu1 %v3260_v23  ;;  %1914 = vmatpush3.bf16.msra.mxu0 %v3271_v61  ;;  %v1615_v14 = vpack.c.bf16 %v1572_v26, %v1565_v48  ;;  %v1574_v1 = vmax.f32 %v1497_v43, 0.0  ;;  %v1503_v23 = vadd.f32 %v3267_v35, %v1371_v2 }
 0x38f   :  { %1737 = vmatprep.subr.bf16.mxu1 %v3282_v4  ;;  %1915 = vmatprep.subr.bf16.mxu0 %v3567_v40  ;;  %v1502_v61 = vadd.f32 %v3267_v35, %v1370_v12  ;;  %v1581_v59 = vmax.f32 %v1504_v44, 0.0 }
 0x390   :  { %v1617_v55 = vpack.c.bf16 %v1574_v1, %v1567_v20  ;;  %v1580_v4 = vmax.f32 %v1503_v23, 0.0 }
 0x391   :  { %v1579_v27 = vmax.f32 %v1502_v61, 0.0  ;;  %v1624_v17 = vpack.c.bf16 %v1581_v59, %v1581_v59 }
 0x392   :  { %1738 = vmatpush1.bf16.msra.mxu1 %v1601_v28  ;;  %1916 = vmatpush3.bf16.msra.mxu0 %v1603_v57  ;;  %v1623_v37 = vpack.c.bf16 %v1580_v4, %v1580_v4 }
 0x393   :  { %1739 = vmatprep.subr.bf16.mxu1 %v1609_v5  ;;  %1917 = vmatprep.subr.bf16.mxu0 %v3567_v40  ;;  %v1622_v8 = vpack.c.bf16 %v1579_v27, %v1579_v27  ;;  %v1649_v28 = vsel %vm1629_vm2, %v1624_v17, 0 }
 0x395   :  { %v1643_v35 = vsel %vm1629_vm2, %v1622_v8, 0 }
 0x396   :  { %1740 = vmatpush1.bf16.msra.mxu1 %v1608_v25  ;;  %1918 = vmatpush3.bf16.msra.mxu0 %v1610_v58 }
 0x397   :  { %1741 = vmatprep.subr.bf16.mxu1 %v1616_v62  ;;  %1919 = vmatprep.subr.bf16.mxu0 %v3567_v40 }
 0x39a   :  { %1742 = vmatpush1.bf16.msra.mxu1 %v1615_v14  ;;  %1920 = vmatpush3.bf16.msra.mxu0 %v1617_v55 }
 0x39b   :  { %1877 = vmatprep.subr.msk.bf16.mxu1 %vm1629_vm2, %v1623_v37  ;;  %1921 = vmatprep.subr.bf16.mxu0 %v3567_v40 }
 0x39e   :  { %1744 = vmatpush1.bf16.msra.mxu1 %v1643_v35  ;;  %1922 = vmatpush3.bf16.msra.mxu0 %v1649_v28 }
 0x3a1   :  { %1878 = vmatmul.mubr.msk.bf16.vlgmr.msra.gmra.mrb[44].mxu1 %vm1625_vm3, %v3305_v7  ;;  %1924 = vmatmul.mubr.msk.bf16.vlgmr.msra.gmra.mrb[48].mxu0 %vm1625_vm3, %v3305_v7 }
 0x45c   :  { %v1685_v21 = vpop.f32.mrb[40].mxu1  ;;  %v1726_v10 = vpop.f32.mrb[44].mxu0 }
 0x45d   :  { %v1814_v54 = vmax.f32 %v1685_v21, 0.0  ;;  %v1687_v36 = vpop.f32.mrb[41].mxu1  ;;  %v1816_v33 = vmax.f32 %v1726_v10, 0.0  ;;  %v1728_v56 = vpop.f32.mrb[45].mxu0 }
 0x45e   :  { %v1815_v16 = vmax.f32 %v1687_v36, 0.0  ;;  %v1689_v47 = vpop.f32.mrb[42].mxu1  ;;  %v1817_v6 = vmax.f32 %v1728_v56, 0.0  ;;  %v1730_v57 = vpop.f32.mrb[46].mxu0 }
 0x45f   :  { %1821 = vst [vmem:[#allocation2] sm:$0xff] %v1814_v54  ;;  %1823 = vst [vmem:[#allocation2 + $0x10] sm:$0xff] %v1816_v33  ;;  %v1690_v50 = vpop.f32.mrb[43].mxu1  ;;  %v1731_v15 = vpop.f32.mrb[47].mxu0 }
 0x460   :  { %1822 = vst [vmem:[#allocation2 + $0x8] sm:$0xff] %v1815_v16  ;;  %1824 = vst [vmem:[#allocation2 + $0x18] sm:$0xff] %v1817_v6 }
 0x474   :  { %v1767_v49 = vpop.f32.mrb[44].mxu1  ;;  %v1808_v7 = vpop.f32.mrb[48].mxu0 }
 0x475   :  { %v1818_v45 = vmax.f32 %v1767_v49, 0.0  ;;  %v1769_v29 = vpop.f32.mrb[45].mxu1  ;;  %v1820_v40 = vmax.f32 %v1808_v7, 0.0  ;;  %v1925_v13 = vpop.f32.mrb[49].mxu0 }
 0x476   :  { %v1819_v24 = vmax.f32 %v1769_v29, 0.0  ;;  %v1771_v53 = vpop.f32.mrb[46].mxu1  ;;  %v1811_v11 = vpop.f32.mrb[50].mxu0 }
 0x477   :  { %1825 = vst [vmem:[#allocation2 + $0x20] sm:$0xff] %v1818_v45  ;;  %1827 = vst [vmem:[#allocation2 + $0x30] sm:$0xff] %v1820_v40  ;;  %v1772_v51 = vpop.f32.mrb[47].mxu1  ;;  %v1926_v5 = vpop.f32.mrb[51].mxu0 }
 0x478   :  { %1826 = vst [vmem:[#allocation2 + $0x28] sm:$0xff] %v1819_v24 }
 0x479   :  { %1998 = shalt.err (!%p1995_p4)
}
 0x47a   :  { %s1999_s2 = scalar_lea.hbm %s3376_s4, 896 }
 0x47b   :  { %p2000_p5 = scmp.ne.s32.totalorder %s3376_s4, %s1999_s2  ;;  %p2003_p6 = scmp.lt.u32.totalorder %s1999_s2, %s3376_s4 }
 0x47d   :  { %p2005_p7 = pnand %p2003_p6, %p2000_p5 }
 0x47f   :  { %2008 = shalt.err (!%p2005_p7)
}
 0x480   :  { %1837 = dma.vmem_to_hbm [thread:$0]  %s1835_s8, 896, %s3376_s4, [#allocation3]  }
 0x481   :  { %2009 = dma.done.wait [#allocation3], 896  }
 0x482   :  { %2010 = vsyncadd [#allocation3], 4294966400 }
 0x483   :  { %1841 = vsyncpa [#allocation3], 1 }

</bundles_post_ra>
